<compile_context>
chip_gen: v5e
topology: v5e:2x2
jax: 0.10.0
libtpu: 0.0.40
codegen_flags: <defaults>
</compile_context>

<pallas_src>
import jax
import jax.numpy as jnp
import numpy as np
from jax import lax
from jax.experimental import pallas as pl
from jax.experimental.pallas import tpu as pltpu

# ---- model hyper-parameters (small, consistent with RNN_Nationality_Predictor) ----
B = 8          # batch (number of names)
T = 12         # maximum_name_length
E = 16         # embedding_dim
H = 32         # hidden_size
C = 6          # output_size = number_of_classes + 1
C_PAD = 128    # lane-dense padded logits width (sliced back to C in the wrapper)
VOCAB = 27     # input_size = 26 lowercase letters + padding index 0

# ---- weight-slab row layout (all blocks 8-row aligned, 128 lanes wide) ----
R_WIH = 0      # rows [0,16):    w_ih gate-packed (E, 3H) in lanes [0,96)
R_WHH = 16     # rows [16,48):   w_hh gate-packed (H, 3H) in lanes [0,96)
R_BIAS = 48    # rows [48,56):   row48=bi(r|z|n, b_hh r/z folded), row49=bh_n,
               #                 row50=b1 (lanes[0,H)), row51=b2 (lanes[0,C))
R_W1 = 56      # rows [56,88):   dense1 (H, H) in lanes [0,H)
R_W2 = 88      # rows [88,120):  dense2 (H, C) in lanes [0,C)
SLAB_ROWS = 120


# ------------------------------ Pallas kernel --------------------------------
def gru_predictor_kernel(lengths_ref, emb_ref, slab_ref, out_ref):
    """Masked GRU recurrence + dense1(relu) + dense2, fully VMEM/vreg resident.

    lengths_ref: (B, 1)        int32  valid sequence lengths
    emb_ref:     (T*B, E)      f32    embedded characters, time-major rows [t*B + b]
    slab_ref:    (SLAB_ROWS,128) f32  packed weights/biases (see layout above)
    out_ref:     (B, C_PAD)    f32    lane-dense logits slab
    """
    # ---- unpack the weight slab with static, sublane-aligned slices ----
    wih = slab_ref[R_WIH:R_WIH + E, :]          # (E, 128)  gate cols [r|z|n|0]
    whh = slab_ref[R_WHH:R_WHH + H, :]          # (H, 128)
    biases = slab_ref[R_BIAS:R_BIAS + 8, :]     # (8, 128)  one vreg
    w1 = slab_ref[R_W1:R_W1 + H, :]             # (H, 128)  lanes [0,H) used
    w2 = slab_ref[R_W2:R_W2 + H, :]             # (H, 128)  lanes [0,C) used
    bi = biases[0:1, :]                         # (1, 128)
    bh = biases[1:2, :]
    b1 = biases[2:3, :]
    b2 = biases[3:4, :]

    lengths = lengths_ref[...]                  # (B, 1) int32

    # ---- prologue: input projection for ALL timesteps and ALL gates at once ----
    # Result (T*B, 128) = 12 vregs; kept as a traced value (no VMEM scratch).
    gi = jnp.dot(emb_ref[...], wih, preferred_element_type=jnp.float32) + bi

    # Hoisted broadcast of the n-gate hidden bias (loop reuses the same value).
    bh_b = jnp.broadcast_to(bh, (B, 128))

    # ---- serial, fully-unrolled GRU recurrence (pack_padded semantics via z) ----
    h = jnp.zeros((B, H), jnp.float32)
    for t in range(T):                                         # static unroll
        gi_t = gi[t * B:(t + 1) * B, :]                        # (B, 128) static slice
        gh = jnp.dot(h, whh, preferred_element_type=jnp.float32) + bh_b   # one fused matmul
        rz = jax.nn.sigmoid(gi_t[:, :2 * H] + gh[:, :2 * H])  # (B, 2H)
        r = rz[:, :H]
        z = rz[:, H:2 * H]
        n = jnp.tanh(gi_t[:, 2 * H:3 * H] + r * gh[:, 2 * H:3 * H])
        # pack_padded_sequence: padded steps freeze h exactly (z := 1 there).
        z = jnp.where(lengths > t, z, 1.0)
        h = (1.0 - z) * n + z * h

    # ---- dense1 -> relu -> (dropout = identity in eval) -> dense2 ----
    h1 = jnp.maximum(jnp.dot(h, w1, preferred_element_type=jnp.float32) + b1, 0.0)
    h1 = h1[:, :H]                                             # drop zero lanes
    out_ref[...] = jnp.dot(h1, w2, preferred_element_type=jnp.float32) + b2


def predictor_logits(lengths_b1, emb_tb_e, slab):
    vmem = pl.BlockSpec(memory_space=pltpu.MemorySpace.VMEM)
    out_pad = pl.pallas_call(
        gru_predictor_kernel,
        out_shape=jax.ShapeDtypeStruct((B, C_PAD), jnp.float32),
        in_specs=[vmem, vmem, vmem],
        out_specs=vmem,
    )(lengths_b1, emb_tb_e, slab)
    return out_pad[:, :C]                                      # (B, C) logits


# ------------------------------ host-side glue --------------------------------
# TODO(synk): string encoding/decoding (NationalityEncoder) is host Python, not kernel work.
CHAR_TO_INDEX = {chr(ord('a') + i): i + 1 for i in range(26)}          # 0 = padding
CLASSES = ['Africa', 'Americas', 'Asia', 'Europe', 'Oceania']          # indices 1..5
INDEX_TO_CLASS = {i + 1: c for i, c in enumerate(CLASSES)}


def encode_names(names):
    idx = np.zeros((len(names), T), dtype=np.int32)
    lens = np.zeros((len(names),), dtype=np.int32)
    for b, name in enumerate(names):
        enc = [CHAR_TO_INDEX.get(ch, 0) for ch in name.lower()][:T]
        idx[b, :len(enc)] = enc
        lens[b] = len(enc)
    return jnp.asarray(idx), jnp.asarray(lens)


def decode_country(logits):
    preds = np.asarray(jnp.argmax(logits, axis=1))
    return [INDEX_TO_CLASS.get(int(p), 'Unknown') for p in preds]


def init_params(key):
    ks = jax.random.split(key, 10)
    s = 1.0 / np.sqrt(H)
    emb_table = jax.random.normal(ks[0], (VOCAB, E), dtype=jnp.float32)
    emb_table = emb_table.at[0].set(0.0)                               # padding_idx=0
    w_ih = jax.random.uniform(ks[1], (E, 3 * H), jnp.float32, -s, s)
    w_hh = jax.random.uniform(ks[2], (H, 3 * H), jnp.float32, -s, s)
    b_ih = jax.random.uniform(ks[3], (1, 3 * H), jnp.float32, -s, s)
    b_hh = jax.random.uniform(ks[4], (1, 3 * H), jnp.float32, -s, s)
    w1 = jax.random.uniform(ks[5], (H, H), jnp.float32, -s, s)
    b1 = jax.random.uniform(ks[6], (1, H), jnp.float32, -s, s)
    w2 = jax.random.uniform(ks[7], (H, C), jnp.float32, -s, s)
    b2 = jax.random.uniform(ks[8], (1, C), jnp.float32, -s, s)
    return emb_table, (w_ih, w_hh, b_ih, b_hh, w1, b1, w2, b2)


def pack_params(params):
    """Host-side packing: one lane-dense (SLAB_ROWS, 128) f32 weight slab.

    NOTE: when loading a real PyTorch checkpoint, nn.Linear weight is (out, in)
    and GRU weight_ih/weight_hh are (3H, in) — transpose them before packing.
    Here init_params already stores the (in, out) convention used below.
    """
    w_ih, w_hh, b_ih, b_hh, w1, b1, w2, b2 = [np.asarray(p, np.float32) for p in params]
    slab = np.zeros((SLAB_ROWS, 128), np.float32)
    slab[R_WIH:R_WIH + E, :3 * H] = w_ih                               # (E, 3H)
    slab[R_WHH:R_WHH + H, :3 * H] = w_hh                               # (H, 3H)
    bi = b_ih.copy()
    bi[:, :2 * H] += b_hh[:, :2 * H]           # fold b_hh into r/z input bias (pre-sigmoid)
    slab[R_BIAS + 0, :3 * H] = bi[0]
    slab[R_BIAS + 1, 2 * H:3 * H] = b_hh[0, 2 * H:]   # n-gate hidden bias stays inside r*(.)
    slab[R_BIAS + 2, :H] = b1[0]
    slab[R_BIAS + 3, :C] = b2[0]
    slab[R_W1:R_W1 + H, :H] = w1
    slab[R_W2:R_W2 + H, :C] = w2
    return jnp.asarray(slab)


def reference_logits(emb_bte, lengths, params):
    """Pure-JAX reference (mirrors pack_padded_sequence + GRU + dense layers)."""
    w_ih, w_hh, b_ih, b_hh, w1, b1, w2, b2 = params
    h = jnp.zeros((B, H), jnp.float32)
    for t in range(T):
        x_t = emb_bte[:, t, :]
        gi = x_t @ w_ih + b_ih
        gh = h @ w_hh + b_hh
        r = jax.nn.sigmoid(gi[:, :H] + gh[:, :H])
        z = jax.nn.sigmoid(gi[:, H:2 * H] + gh[:, H:2 * H])
        n = jnp.tanh(gi[:, 2 * H:] + r * gh[:, 2 * H:])
        h_new = (1.0 - z) * n + z * h
        h = jnp.where((t < lengths)[:, None], h_new, h)
    h1 = jnp.maximum(h @ w1 + b1, 0.0)
    return h1 @ w2 + b2


if __name__ == "__main__":
    key = jax.random.PRNGKey(0)
    emb_table, params = init_params(key)
    slab = pack_params(params)

    names = ["smith", "garcia", "mueller", "tanaka",
             "kowalski", "rossi", "ivanov", "chen"]
    name_idx, lengths = encode_names(names)                # (B, T) int32, (B,) int32

    # Embedding lookup (glue), then time-major (T*B, E) layout for the kernel so the
    # whole input projection is a single MXU pass.
    emb_bte = jnp.take(emb_table, name_idx, axis=0)        # (B, T, E)
    emb_tb_e = jnp.transpose(emb_bte, (1, 0, 2)).reshape(T * B, E)   # (T*B, E)
    lengths_b1 = lengths.reshape(B, 1).astype(jnp.int32)   # (B, 1)

    logits = predictor_logits(lengths_b1, emb_tb_e, slab)
    logits = jax.block_until_ready(logits)

    ref = jax.block_until_ready(reference_logits(emb_bte, lengths, params))
    np.testing.assert_allclose(np.asarray(logits), np.asarray(ref),
                               rtol=1e-5, atol=1e-5)

    _labels = decode_country(logits)                       # forward() return value
    print("KERNEL_OK")
</pallas_src>

<mosaic_0001>
module attributes {stable_mosaic.version = 11 : i64} {
  func.func @gru_predictor_kernel(%arg0: memref<8x1xi32, #tpu.memory_space<vmem>>, %arg1: memref<96x16xf32, #tpu.memory_space<vmem>>, %arg2: memref<120x128xf32, #tpu.memory_space<vmem>>, %arg3: memref<8x128xf32, #tpu.memory_space<vmem>>) attributes {dimension_semantics = [], scalar_prefetch = 0 : i64, scratch_operands = 0 : i64, tpu.core_type = #tpu.core_type<tc>} {
    %c0 = arith.constant 0 : index
    %c0_0 = arith.constant 0 : index
    %0 = vector.load %arg2[%c0, %c0_0] : memref<120x128xf32, #tpu.memory_space<vmem>>, vector<16x128xf32>
    %c16 = arith.constant 16 : index
    %c0_1 = arith.constant 0 : index
    %1 = vector.load %arg2[%c16, %c0_1] : memref<120x128xf32, #tpu.memory_space<vmem>>, vector<32x128xf32>
    %c48 = arith.constant 48 : index
    %c0_2 = arith.constant 0 : index
    %2 = vector.load %arg2[%c48, %c0_2] : memref<120x128xf32, #tpu.memory_space<vmem>>, vector<8x128xf32>
    %c56 = arith.constant 56 : index
    %c0_3 = arith.constant 0 : index
    %3 = vector.load %arg2[%c56, %c0_3] : memref<120x128xf32, #tpu.memory_space<vmem>>, vector<32x128xf32>
    %c88 = arith.constant 88 : index
    %c0_4 = arith.constant 0 : index
    %4 = vector.load %arg2[%c88, %c0_4] : memref<120x128xf32, #tpu.memory_space<vmem>>, vector<32x128xf32>
    %5 = vector.extract_strided_slice %2 {offsets = [0, 0], sizes = [1, 128], strides = [1, 1]} : vector<8x128xf32> to vector<1x128xf32>
    %6 = vector.extract_strided_slice %2 {offsets = [1, 0], sizes = [1, 128], strides = [1, 1]} : vector<8x128xf32> to vector<1x128xf32>
    %7 = vector.extract_strided_slice %2 {offsets = [2, 0], sizes = [1, 128], strides = [1, 1]} : vector<8x128xf32> to vector<1x128xf32>
    %8 = vector.extract_strided_slice %2 {offsets = [3, 0], sizes = [1, 128], strides = [1, 1]} : vector<8x128xf32> to vector<1x128xf32>
    %c0_5 = arith.constant 0 : index
    %c0_6 = arith.constant 0 : index
    %9 = vector.load %arg0[%c0_5, %c0_6] : memref<8x1xi32, #tpu.memory_space<vmem>>, vector<8x1xi32>
    %c0_7 = arith.constant 0 : index
    %c0_8 = arith.constant 0 : index
    %10 = vector.load %arg1[%c0_7, %c0_8] : memref<96x16xf32, #tpu.memory_space<vmem>>, vector<96x16xf32>
    %cst = arith.constant dense<0.000000e+00> : vector<96x128xf32>
    %11 = tpu.matmul %10, %0, %cst {dimension_numbers = #tpu.dot_dimension_numbers<[1], [0], [0], [1], [0, 0, 1, 1], [], []>} : vector<96x16xf32>, vector<16x128xf32>, vector<96x128xf32> -> vector<96x128xf32>
    %12 = vector.broadcast %5 : vector<1x128xf32> to vector<96x128xf32>
    %13 = arith.addf %11, %12 : vector<96x128xf32>
    %14 = vector.shape_cast %6 : vector<1x128xf32> to vector<1x128xf32>
    %15 = vector.broadcast %14 : vector<1x128xf32> to vector<8x128xf32>
    %cst_9 = arith.constant 0.000000e+00 : f32
    %16 = vector.broadcast %cst_9 : f32 to vector<8x32xf32>
    %17 = vector.extract_strided_slice %13 {offsets = [0, 0], sizes = [8, 128], strides = [1, 1]} : vector<96x128xf32> to vector<8x128xf32>
    %cst_10 = arith.constant dense<0.000000e+00> : vector<8x128xf32>
    %18 = tpu.matmul %16, %1, %cst_10 {dimension_numbers = #tpu.dot_dimension_numbers<[1], [0], [0], [1], [0, 0, 1, 1], [], []>} : vector<8x32xf32>, vector<32x128xf32>, vector<8x128xf32> -> vector<8x128xf32>
    %19 = arith.addf %18, %15 : vector<8x128xf32>
    %20 = vector.extract_strided_slice %17 {offsets = [0, 0], sizes = [8, 64], strides = [1, 1]} : vector<8x128xf32> to vector<8x64xf32>
    %21 = vector.extract_strided_slice %19 {offsets = [0, 0], sizes = [8, 64], strides = [1, 1]} : vector<8x128xf32> to vector<8x64xf32>
    %22 = arith.addf %20, %21 : vector<8x64xf32>
    %23 = arith.negf %22 : vector<8x64xf32>
    %24 = math.exp %23 : vector<8x64xf32>
    %cst_11 = arith.constant 1.000000e+00 : f32
    %25 = vector.broadcast %cst_11 : f32 to vector<8x64xf32>
    %26 = arith.addf %25, %24 : vector<8x64xf32>
    %27 = arith.divf %25, %26 : vector<8x64xf32>
    %28 = vector.extract_strided_slice %27 {offsets = [0, 0], sizes = [8, 32], strides = [1, 1]} : vector<8x64xf32> to vector<8x32xf32>
    %29 = vector.extract_strided_slice %27 {offsets = [0, 32], sizes = [8, 32], strides = [1, 1]} : vector<8x64xf32> to vector<8x32xf32>
    %30 = vector.extract_strided_slice %17 {offsets = [0, 64], sizes = [8, 32], strides = [1, 1]} : vector<8x128xf32> to vector<8x32xf32>
    %31 = vector.extract_strided_slice %19 {offsets = [0, 64], sizes = [8, 32], strides = [1, 1]} : vector<8x128xf32> to vector<8x32xf32>
    %32 = arith.mulf %28, %31 : vector<8x32xf32>
    %33 = arith.addf %30, %32 : vector<8x32xf32>
    %34 = math.tanh %33 : vector<8x32xf32>
    %c0_i32 = arith.constant 0 : i32
    %35 = vector.broadcast %c0_i32 : i32 to vector<8x1xi32>
    %36 = arith.cmpi sgt, %9, %35 : vector<8x1xi32>
    %cst_12 = arith.constant 1.000000e+00 : f32
    %37 = vector.shape_cast %36 : vector<8x1xi1> to vector<8x1xi1>
    %38 = vector.broadcast %37 : vector<8x1xi1> to vector<8x32xi1>
    %39 = vector.broadcast %cst_12 : f32 to vector<8x32xf32>
    %40 = arith.select %38, %29, %39 : vector<8x32xi1>, vector<8x32xf32>
    %cst_13 = arith.constant 1.000000e+00 : f32
    %41 = vector.broadcast %cst_13 : f32 to vector<8x32xf32>
    %42 = arith.subf %41, %40 : vector<8x32xf32>
    %43 = arith.mulf %42, %34 : vector<8x32xf32>
    %44 = arith.mulf %40, %16 : vector<8x32xf32>
    %45 = arith.addf %43, %44 : vector<8x32xf32>
    %46 = vector.extract_strided_slice %13 {offsets = [8, 0], sizes = [8, 128], strides = [1, 1]} : vector<96x128xf32> to vector<8x128xf32>
    %cst_14 = arith.constant dense<0.000000e+00> : vector<8x128xf32>
    %47 = tpu.matmul %45, %1, %cst_14 {dimension_numbers = #tpu.dot_dimension_numbers<[1], [0], [0], [1], [0, 0, 1, 1], [], []>} : vector<8x32xf32>, vector<32x128xf32>, vector<8x128xf32> -> vector<8x128xf32>
    %48 = arith.addf %47, %15 : vector<8x128xf32>
    %49 = vector.extract_strided_slice %46 {offsets = [0, 0], sizes = [8, 64], strides = [1, 1]} : vector<8x128xf32> to vector<8x64xf32>
    %50 = vector.extract_strided_slice %48 {offsets = [0, 0], sizes = [8, 64], strides = [1, 1]} : vector<8x128xf32> to vector<8x64xf32>
    %51 = arith.addf %49, %50 : vector<8x64xf32>
    %52 = arith.negf %51 : vector<8x64xf32>
    %53 = math.exp %52 : vector<8x64xf32>
    %cst_15 = arith.constant 1.000000e+00 : f32
    %54 = vector.broadcast %cst_15 : f32 to vector<8x64xf32>
    %55 = arith.addf %54, %53 : vector<8x64xf32>
    %56 = arith.divf %54, %55 : vector<8x64xf32>
    %57 = vector.extract_strided_slice %56 {offsets = [0, 0], sizes = [8, 32], strides = [1, 1]} : vector<8x64xf32> to vector<8x32xf32>
    %58 = vector.extract_strided_slice %56 {offsets = [0, 32], sizes = [8, 32], strides = [1, 1]} : vector<8x64xf32> to vector<8x32xf32>
    %59 = vector.extract_strided_slice %46 {offsets = [0, 64], sizes = [8, 32], strides = [1, 1]} : vector<8x128xf32> to vector<8x32xf32>
    %60 = vector.extract_strided_slice %48 {offsets = [0, 64], sizes = [8, 32], strides = [1, 1]} : vector<8x128xf32> to vector<8x32xf32>
    %61 = arith.mulf %57, %60 : vector<8x32xf32>
    %62 = arith.addf %59, %61 : vector<8x32xf32>
    %63 = math.tanh %62 : vector<8x32xf32>
    %c1_i32 = arith.constant 1 : i32
    %64 = vector.broadcast %c1_i32 : i32 to vector<8x1xi32>
    %65 = arith.cmpi sgt, %9, %64 : vector<8x1xi32>
    %cst_16 = arith.constant 1.000000e+00 : f32
    %66 = vector.shape_cast %65 : vector<8x1xi1> to vector<8x1xi1>
    %67 = vector.broadcast %66 : vector<8x1xi1> to vector<8x32xi1>
    %68 = vector.broadcast %cst_16 : f32 to vector<8x32xf32>
    %69 = arith.select %67, %58, %68 : vector<8x32xi1>, vector<8x32xf32>
    %cst_17 = arith.constant 1.000000e+00 : f32
    %70 = vector.broadcast %cst_17 : f32 to vector<8x32xf32>
    %71 = arith.subf %70, %69 : vector<8x32xf32>
    %72 = arith.mulf %71, %63 : vector<8x32xf32>
    %73 = arith.mulf %69, %45 : vector<8x32xf32>
    %74 = arith.addf %72, %73 : vector<8x32xf32>
    %75 = vector.extract_strided_slice %13 {offsets = [16, 0], sizes = [8, 128], strides = [1, 1]} : vector<96x128xf32> to vector<8x128xf32>
    %cst_18 = arith.constant dense<0.000000e+00> : vector<8x128xf32>
    %76 = tpu.matmul %74, %1, %cst_18 {dimension_numbers = #tpu.dot_dimension_numbers<[1], [0], [0], [1], [0, 0, 1, 1], [], []>} : vector<8x32xf32>, vector<32x128xf32>, vector<8x128xf32> -> vector<8x128xf32>
    %77 = arith.addf %76, %15 : vector<8x128xf32>
    %78 = vector.extract_strided_slice %75 {offsets = [0, 0], sizes = [8, 64], strides = [1, 1]} : vector<8x128xf32> to vector<8x64xf32>
    %79 = vector.extract_strided_slice %77 {offsets = [0, 0], sizes = [8, 64], strides = [1, 1]} : vector<8x128xf32> to vector<8x64xf32>
    %80 = arith.addf %78, %79 : vector<8x64xf32>
    %81 = arith.negf %80 : vector<8x64xf32>
    %82 = math.exp %81 : vector<8x64xf32>
    %cst_19 = arith.constant 1.000000e+00 : f32
    %83 = vector.broadcast %cst_19 : f32 to vector<8x64xf32>
    %84 = arith.addf %83, %82 : vector<8x64xf32>
    %85 = arith.divf %83, %84 : vector<8x64xf32>
    %86 = vector.extract_strided_slice %85 {offsets = [0, 0], sizes = [8, 32], strides = [1, 1]} : vector<8x64xf32> to vector<8x32xf32>
    %87 = vector.extract_strided_slice %85 {offsets = [0, 32], sizes = [8, 32], strides = [1, 1]} : vector<8x64xf32> to vector<8x32xf32>
    %88 = vector.extract_strided_slice %75 {offsets = [0, 64], sizes = [8, 32], strides = [1, 1]} : vector<8x128xf32> to vector<8x32xf32>
    %89 = vector.extract_strided_slice %77 {offsets = [0, 64], sizes = [8, 32], strides = [1, 1]} : vector<8x128xf32> to vector<8x32xf32>
    %90 = arith.mulf %86, %89 : vector<8x32xf32>
    %91 = arith.addf %88, %90 : vector<8x32xf32>
    %92 = math.tanh %91 : vector<8x32xf32>
    %c2_i32 = arith.constant 2 : i32
    %93 = vector.broadcast %c2_i32 : i32 to vector<8x1xi32>
    %94 = arith.cmpi sgt, %9, %93 : vector<8x1xi32>
    %cst_20 = arith.constant 1.000000e+00 : f32
    %95 = vector.shape_cast %94 : vector<8x1xi1> to vector<8x1xi1>
    %96 = vector.broadcast %95 : vector<8x1xi1> to vector<8x32xi1>
    %97 = vector.broadcast %cst_20 : f32 to vector<8x32xf32>
    %98 = arith.select %96, %87, %97 : vector<8x32xi1>, vector<8x32xf32>
    %cst_21 = arith.constant 1.000000e+00 : f32
    %99 = vector.broadcast %cst_21 : f32 to vector<8x32xf32>
    %100 = arith.subf %99, %98 : vector<8x32xf32>
    %101 = arith.mulf %100, %92 : vector<8x32xf32>
    %102 = arith.mulf %98, %74 : vector<8x32xf32>
    %103 = arith.addf %101, %102 : vector<8x32xf32>
    %104 = vector.extract_strided_slice %13 {offsets = [24, 0], sizes = [8, 128], strides = [1, 1]} : vector<96x128xf32> to vector<8x128xf32>
    %cst_22 = arith.constant dense<0.000000e+00> : vector<8x128xf32>
    %105 = tpu.matmul %103, %1, %cst_22 {dimension_numbers = #tpu.dot_dimension_numbers<[1], [0], [0], [1], [0, 0, 1, 1], [], []>} : vector<8x32xf32>, vector<32x128xf32>, vector<8x128xf32> -> vector<8x128xf32>
    %106 = arith.addf %105, %15 : vector<8x128xf32>
    %107 = vector.extract_strided_slice %104 {offsets = [0, 0], sizes = [8, 64], strides = [1, 1]} : vector<8x128xf32> to vector<8x64xf32>
    %108 = vector.extract_strided_slice %106 {offsets = [0, 0], sizes = [8, 64], strides = [1, 1]} : vector<8x128xf32> to vector<8x64xf32>
    %109 = arith.addf %107, %108 : vector<8x64xf32>
    %110 = arith.negf %109 : vector<8x64xf32>
    %111 = math.exp %110 : vector<8x64xf32>
    %cst_23 = arith.constant 1.000000e+00 : f32
    %112 = vector.broadcast %cst_23 : f32 to vector<8x64xf32>
    %113 = arith.addf %112, %111 : vector<8x64xf32>
    %114 = arith.divf %112, %113 : vector<8x64xf32>
    %115 = vector.extract_strided_slice %114 {offsets = [0, 0], sizes = [8, 32], strides = [1, 1]} : vector<8x64xf32> to vector<8x32xf32>
    %116 = vector.extract_strided_slice %114 {offsets = [0, 32], sizes = [8, 32], strides = [1, 1]} : vector<8x64xf32> to vector<8x32xf32>
    %117 = vector.extract_strided_slice %104 {offsets = [0, 64], sizes = [8, 32], strides = [1, 1]} : vector<8x128xf32> to vector<8x32xf32>
    %118 = vector.extract_strided_slice %106 {offsets = [0, 64], sizes = [8, 32], strides = [1, 1]} : vector<8x128xf32> to vector<8x32xf32>
    %119 = arith.mulf %115, %118 : vector<8x32xf32>
    %120 = arith.addf %117, %119 : vector<8x32xf32>
    %121 = math.tanh %120 : vector<8x32xf32>
    %c3_i32 = arith.constant 3 : i32
    %122 = vector.broadcast %c3_i32 : i32 to vector<8x1xi32>
    %123 = arith.cmpi sgt, %9, %122 : vector<8x1xi32>
    %cst_24 = arith.constant 1.000000e+00 : f32
    %124 = vector.shape_cast %123 : vector<8x1xi1> to vector<8x1xi1>
    %125 = vector.broadcast %124 : vector<8x1xi1> to vector<8x32xi1>
    %126 = vector.broadcast %cst_24 : f32 to vector<8x32xf32>
    %127 = arith.select %125, %116, %126 : vector<8x32xi1>, vector<8x32xf32>
    %cst_25 = arith.constant 1.000000e+00 : f32
    %128 = vector.broadcast %cst_25 : f32 to vector<8x32xf32>
    %129 = arith.subf %128, %127 : vector<8x32xf32>
    %130 = arith.mulf %129, %121 : vector<8x32xf32>
    %131 = arith.mulf %127, %103 : vector<8x32xf32>
    %132 = arith.addf %130, %131 : vector<8x32xf32>
    %133 = vector.extract_strided_slice %13 {offsets = [32, 0], sizes = [8, 128], strides = [1, 1]} : vector<96x128xf32> to vector<8x128xf32>
    %cst_26 = arith.constant dense<0.000000e+00> : vector<8x128xf32>
    %134 = tpu.matmul %132, %1, %cst_26 {dimension_numbers = #tpu.dot_dimension_numbers<[1], [0], [0], [1], [0, 0, 1, 1], [], []>} : vector<8x32xf32>, vector<32x128xf32>, vector<8x128xf32> -> vector<8x128xf32>
    %135 = arith.addf %134, %15 : vector<8x128xf32>
    %136 = vector.extract_strided_slice %133 {offsets = [0, 0], sizes = [8, 64], strides = [1, 1]} : vector<8x128xf32> to vector<8x64xf32>
    %137 = vector.extract_strided_slice %135 {offsets = [0, 0], sizes = [8, 64], strides = [1, 1]} : vector<8x128xf32> to vector<8x64xf32>
    %138 = arith.addf %136, %137 : vector<8x64xf32>
    %139 = arith.negf %138 : vector<8x64xf32>
    %140 = math.exp %139 : vector<8x64xf32>
    %cst_27 = arith.constant 1.000000e+00 : f32
    %141 = vector.broadcast %cst_27 : f32 to vector<8x64xf32>
    %142 = arith.addf %141, %140 : vector<8x64xf32>
    %143 = arith.divf %141, %142 : vector<8x64xf32>
    %144 = vector.extract_strided_slice %143 {offsets = [0, 0], sizes = [8, 32], strides = [1, 1]} : vector<8x64xf32> to vector<8x32xf32>
    %145 = vector.extract_strided_slice %143 {offsets = [0, 32], sizes = [8, 32], strides = [1, 1]} : vector<8x64xf32> to vector<8x32xf32>
    %146 = vector.extract_strided_slice %133 {offsets = [0, 64], sizes = [8, 32], strides = [1, 1]} : vector<8x128xf32> to vector<8x32xf32>
    %147 = vector.extract_strided_slice %135 {offsets = [0, 64], sizes = [8, 32], strides = [1, 1]} : vector<8x128xf32> to vector<8x32xf32>
    %148 = arith.mulf %144, %147 : vector<8x32xf32>
    %149 = arith.addf %146, %148 : vector<8x32xf32>
    %150 = math.tanh %149 : vector<8x32xf32>
    %c4_i32 = arith.constant 4 : i32
    %151 = vector.broadcast %c4_i32 : i32 to vector<8x1xi32>
    %152 = arith.cmpi sgt, %9, %151 : vector<8x1xi32>
    %cst_28 = arith.constant 1.000000e+00 : f32
    %153 = vector.shape_cast %152 : vector<8x1xi1> to vector<8x1xi1>
    %154 = vector.broadcast %153 : vector<8x1xi1> to vector<8x32xi1>
    %155 = vector.broadcast %cst_28 : f32 to vector<8x32xf32>
    %156 = arith.select %154, %145, %155 : vector<8x32xi1>, vector<8x32xf32>
    %cst_29 = arith.constant 1.000000e+00 : f32
    %157 = vector.broadcast %cst_29 : f32 to vector<8x32xf32>
    %158 = arith.subf %157, %156 : vector<8x32xf32>
    %159 = arith.mulf %158, %150 : vector<8x32xf32>
    %160 = arith.mulf %156, %132 : vector<8x32xf32>
    %161 = arith.addf %159, %160 : vector<8x32xf32>
    %162 = vector.extract_strided_slice %13 {offsets = [40, 0], sizes = [8, 128], strides = [1, 1]} : vector<96x128xf32> to vector<8x128xf32>
    %cst_30 = arith.constant dense<0.000000e+00> : vector<8x128xf32>
    %163 = tpu.matmul %161, %1, %cst_30 {dimension_numbers = #tpu.dot_dimension_numbers<[1], [0], [0], [1], [0, 0, 1, 1], [], []>} : vector<8x32xf32>, vector<32x128xf32>, vector<8x128xf32> -> vector<8x128xf32>
    %164 = arith.addf %163, %15 : vector<8x128xf32>
    %165 = vector.extract_strided_slice %162 {offsets = [0, 0], sizes = [8, 64], strides = [1, 1]} : vector<8x128xf32> to vector<8x64xf32>
    %166 = vector.extract_strided_slice %164 {offsets = [0, 0], sizes = [8, 64], strides = [1, 1]} : vector<8x128xf32> to vector<8x64xf32>
    %167 = arith.addf %165, %166 : vector<8x64xf32>
    %168 = arith.negf %167 : vector<8x64xf32>
    %169 = math.exp %168 : vector<8x64xf32>
    %cst_31 = arith.constant 1.000000e+00 : f32
    %170 = vector.broadcast %cst_31 : f32 to vector<8x64xf32>
    %171 = arith.addf %170, %169 : vector<8x64xf32>
    %172 = arith.divf %170, %171 : vector<8x64xf32>
    %173 = vector.extract_strided_slice %172 {offsets = [0, 0], sizes = [8, 32], strides = [1, 1]} : vector<8x64xf32> to vector<8x32xf32>
    %174 = vector.extract_strided_slice %172 {offsets = [0, 32], sizes = [8, 32], strides = [1, 1]} : vector<8x64xf32> to vector<8x32xf32>
    %175 = vector.extract_strided_slice %162 {offsets = [0, 64], sizes = [8, 32], strides = [1, 1]} : vector<8x128xf32> to vector<8x32xf32>
    %176 = vector.extract_strided_slice %164 {offsets = [0, 64], sizes = [8, 32], strides = [1, 1]} : vector<8x128xf32> to vector<8x32xf32>
    %177 = arith.mulf %173, %176 : vector<8x32xf32>
    %178 = arith.addf %175, %177 : vector<8x32xf32>
    %179 = math.tanh %178 : vector<8x32xf32>
    %c5_i32 = arith.constant 5 : i32
    %180 = vector.broadcast %c5_i32 : i32 to vector<8x1xi32>
    %181 = arith.cmpi sgt, %9, %180 : vector<8x1xi32>
    %cst_32 = arith.constant 1.000000e+00 : f32
    %182 = vector.shape_cast %181 : vector<8x1xi1> to vector<8x1xi1>
    %183 = vector.broadcast %182 : vector<8x1xi1> to vector<8x32xi1>
    %184 = vector.broadcast %cst_32 : f32 to vector<8x32xf32>
    %185 = arith.select %183, %174, %184 : vector<8x32xi1>, vector<8x32xf32>
    %cst_33 = arith.constant 1.000000e+00 : f32
    %186 = vector.broadcast %cst_33 : f32 to vector<8x32xf32>
    %187 = arith.subf %186, %185 : vector<8x32xf32>
    %188 = arith.mulf %187, %179 : vector<8x32xf32>
    %189 = arith.mulf %185, %161 : vector<8x32xf32>
    %190 = arith.addf %188, %189 : vector<8x32xf32>
    %191 = vector.extract_strided_slice %13 {offsets = [48, 0], sizes = [8, 128], strides = [1, 1]} : vector<96x128xf32> to vector<8x128xf32>
    %cst_34 = arith.constant dense<0.000000e+00> : vector<8x128xf32>
    %192 = tpu.matmul %190, %1, %cst_34 {dimension_numbers = #tpu.dot_dimension_numbers<[1], [0], [0], [1], [0, 0, 1, 1], [], []>} : vector<8x32xf32>, vector<32x128xf32>, vector<8x128xf32> -> vector<8x128xf32>
    %193 = arith.addf %192, %15 : vector<8x128xf32>
    %194 = vector.extract_strided_slice %191 {offsets = [0, 0], sizes = [8, 64], strides = [1, 1]} : vector<8x128xf32> to vector<8x64xf32>
    %195 = vector.extract_strided_slice %193 {offsets = [0, 0], sizes = [8, 64], strides = [1, 1]} : vector<8x128xf32> to vector<8x64xf32>
    %196 = arith.addf %194, %195 : vector<8x64xf32>
    %197 = arith.negf %196 : vector<8x64xf32>
    %198 = math.exp %197 : vector<8x64xf32>
    %cst_35 = arith.constant 1.000000e+00 : f32
    %199 = vector.broadcast %cst_35 : f32 to vector<8x64xf32>
    %200 = arith.addf %199, %198 : vector<8x64xf32>
    %201 = arith.divf %199, %200 : vector<8x64xf32>
    %202 = vector.extract_strided_slice %201 {offsets = [0, 0], sizes = [8, 32], strides = [1, 1]} : vector<8x64xf32> to vector<8x32xf32>
    %203 = vector.extract_strided_slice %201 {offsets = [0, 32], sizes = [8, 32], strides = [1, 1]} : vector<8x64xf32> to vector<8x32xf32>
    %204 = vector.extract_strided_slice %191 {offsets = [0, 64], sizes = [8, 32], strides = [1, 1]} : vector<8x128xf32> to vector<8x32xf32>
    %205 = vector.extract_strided_slice %193 {offsets = [0, 64], sizes = [8, 32], strides = [1, 1]} : vector<8x128xf32> to vector<8x32xf32>
    %206 = arith.mulf %202, %205 : vector<8x32xf32>
    %207 = arith.addf %204, %206 : vector<8x32xf32>
    %208 = math.tanh %207 : vector<8x32xf32>
    %c6_i32 = arith.constant 6 : i32
    %209 = vector.broadcast %c6_i32 : i32 to vector<8x1xi32>
    %210 = arith.cmpi sgt, %9, %209 : vector<8x1xi32>
    %cst_36 = arith.constant 1.000000e+00 : f32
    %211 = vector.shape_cast %210 : vector<8x1xi1> to vector<8x1xi1>
    %212 = vector.broadcast %211 : vector<8x1xi1> to vector<8x32xi1>
    %213 = vector.broadcast %cst_36 : f32 to vector<8x32xf32>
    %214 = arith.select %212, %203, %213 : vector<8x32xi1>, vector<8x32xf32>
    %cst_37 = arith.constant 1.000000e+00 : f32
    %215 = vector.broadcast %cst_37 : f32 to vector<8x32xf32>
    %216 = arith.subf %215, %214 : vector<8x32xf32>
    %217 = arith.mulf %216, %208 : vector<8x32xf32>
    %218 = arith.mulf %214, %190 : vector<8x32xf32>
    %219 = arith.addf %217, %218 : vector<8x32xf32>
    %220 = vector.extract_strided_slice %13 {offsets = [56, 0], sizes = [8, 128], strides = [1, 1]} : vector<96x128xf32> to vector<8x128xf32>
    %cst_38 = arith.constant dense<0.000000e+00> : vector<8x128xf32>
    %221 = tpu.matmul %219, %1, %cst_38 {dimension_numbers = #tpu.dot_dimension_numbers<[1], [0], [0], [1], [0, 0, 1, 1], [], []>} : vector<8x32xf32>, vector<32x128xf32>, vector<8x128xf32> -> vector<8x128xf32>
    %222 = arith.addf %221, %15 : vector<8x128xf32>
    %223 = vector.extract_strided_slice %220 {offsets = [0, 0], sizes = [8, 64], strides = [1, 1]} : vector<8x128xf32> to vector<8x64xf32>
    %224 = vector.extract_strided_slice %222 {offsets = [0, 0], sizes = [8, 64], strides = [1, 1]} : vector<8x128xf32> to vector<8x64xf32>
    %225 = arith.addf %223, %224 : vector<8x64xf32>
    %226 = arith.negf %225 : vector<8x64xf32>
    %227 = math.exp %226 : vector<8x64xf32>
    %cst_39 = arith.constant 1.000000e+00 : f32
    %228 = vector.broadcast %cst_39 : f32 to vector<8x64xf32>
    %229 = arith.addf %228, %227 : vector<8x64xf32>
    %230 = arith.divf %228, %229 : vector<8x64xf32>
    %231 = vector.extract_strided_slice %230 {offsets = [0, 0], sizes = [8, 32], strides = [1, 1]} : vector<8x64xf32> to vector<8x32xf32>
    %232 = vector.extract_strided_slice %230 {offsets = [0, 32], sizes = [8, 32], strides = [1, 1]} : vector<8x64xf32> to vector<8x32xf32>
    %233 = vector.extract_strided_slice %220 {offsets = [0, 64], sizes = [8, 32], strides = [1, 1]} : vector<8x128xf32> to vector<8x32xf32>
    %234 = vector.extract_strided_slice %222 {offsets = [0, 64], sizes = [8, 32], strides = [1, 1]} : vector<8x128xf32> to vector<8x32xf32>
    %235 = arith.mulf %231, %234 : vector<8x32xf32>
    %236 = arith.addf %233, %235 : vector<8x32xf32>
    %237 = math.tanh %236 : vector<8x32xf32>
    %c7_i32 = arith.constant 7 : i32
    %238 = vector.broadcast %c7_i32 : i32 to vector<8x1xi32>
    %239 = arith.cmpi sgt, %9, %238 : vector<8x1xi32>
    %cst_40 = arith.constant 1.000000e+00 : f32
    %240 = vector.shape_cast %239 : vector<8x1xi1> to vector<8x1xi1>
    %241 = vector.broadcast %240 : vector<8x1xi1> to vector<8x32xi1>
    %242 = vector.broadcast %cst_40 : f32 to vector<8x32xf32>
    %243 = arith.select %241, %232, %242 : vector<8x32xi1>, vector<8x32xf32>
    %cst_41 = arith.constant 1.000000e+00 : f32
    %244 = vector.broadcast %cst_41 : f32 to vector<8x32xf32>
    %245 = arith.subf %244, %243 : vector<8x32xf32>
    %246 = arith.mulf %245, %237 : vector<8x32xf32>
    %247 = arith.mulf %243, %219 : vector<8x32xf32>
    %248 = arith.addf %246, %247 : vector<8x32xf32>
    %249 = vector.extract_strided_slice %13 {offsets = [64, 0], sizes = [8, 128], strides = [1, 1]} : vector<96x128xf32> to vector<8x128xf32>
    %cst_42 = arith.constant dense<0.000000e+00> : vector<8x128xf32>
    %250 = tpu.matmul %248, %1, %cst_42 {dimension_numbers = #tpu.dot_dimension_numbers<[1], [0], [0], [1], [0, 0, 1, 1], [], []>} : vector<8x32xf32>, vector<32x128xf32>, vector<8x128xf32> -> vector<8x128xf32>
    %251 = arith.addf %250, %15 : vector<8x128xf32>
    %252 = vector.extract_strided_slice %249 {offsets = [0, 0], sizes = [8, 64], strides = [1, 1]} : vector<8x128xf32> to vector<8x64xf32>
    %253 = vector.extract_strided_slice %251 {offsets = [0, 0], sizes = [8, 64], strides = [1, 1]} : vector<8x128xf32> to vector<8x64xf32>
    %254 = arith.addf %252, %253 : vector<8x64xf32>
    %255 = arith.negf %254 : vector<8x64xf32>
    %256 = math.exp %255 : vector<8x64xf32>
    %cst_43 = arith.constant 1.000000e+00 : f32
    %257 = vector.broadcast %cst_43 : f32 to vector<8x64xf32>
    %258 = arith.addf %257, %256 : vector<8x64xf32>
    %259 = arith.divf %257, %258 : vector<8x64xf32>
    %260 = vector.extract_strided_slice %259 {offsets = [0, 0], sizes = [8, 32], strides = [1, 1]} : vector<8x64xf32> to vector<8x32xf32>
    %261 = vector.extract_strided_slice %259 {offsets = [0, 32], sizes = [8, 32], strides = [1, 1]} : vector<8x64xf32> to vector<8x32xf32>
    %262 = vector.extract_strided_slice %249 {offsets = [0, 64], sizes = [8, 32], strides = [1, 1]} : vector<8x128xf32> to vector<8x32xf32>
    %263 = vector.extract_strided_slice %251 {offsets = [0, 64], sizes = [8, 32], strides = [1, 1]} : vector<8x128xf32> to vector<8x32xf32>
    %264 = arith.mulf %260, %263 : vector<8x32xf32>
    %265 = arith.addf %262, %264 : vector<8x32xf32>
    %266 = math.tanh %265 : vector<8x32xf32>
    %c8_i32 = arith.constant 8 : i32
    %267 = vector.broadcast %c8_i32 : i32 to vector<8x1xi32>
    %268 = arith.cmpi sgt, %9, %267 : vector<8x1xi32>
    %cst_44 = arith.constant 1.000000e+00 : f32
    %269 = vector.shape_cast %268 : vector<8x1xi1> to vector<8x1xi1>
    %270 = vector.broadcast %269 : vector<8x1xi1> to vector<8x32xi1>
    %271 = vector.broadcast %cst_44 : f32 to vector<8x32xf32>
    %272 = arith.select %270, %261, %271 : vector<8x32xi1>, vector<8x32xf32>
    %cst_45 = arith.constant 1.000000e+00 : f32
    %273 = vector.broadcast %cst_45 : f32 to vector<8x32xf32>
    %274 = arith.subf %273, %272 : vector<8x32xf32>
    %275 = arith.mulf %274, %266 : vector<8x32xf32>
    %276 = arith.mulf %272, %248 : vector<8x32xf32>
    %277 = arith.addf %275, %276 : vector<8x32xf32>
    %278 = vector.extract_strided_slice %13 {offsets = [72, 0], sizes = [8, 128], strides = [1, 1]} : vector<96x128xf32> to vector<8x128xf32>
    %cst_46 = arith.constant dense<0.000000e+00> : vector<8x128xf32>
    %279 = tpu.matmul %277, %1, %cst_46 {dimension_numbers = #tpu.dot_dimension_numbers<[1], [0], [0], [1], [0, 0, 1, 1], [], []>} : vector<8x32xf32>, vector<32x128xf32>, vector<8x128xf32> -> vector<8x128xf32>
    %280 = arith.addf %279, %15 : vector<8x128xf32>
    %281 = vector.extract_strided_slice %278 {offsets = [0, 0], sizes = [8, 64], strides = [1, 1]} : vector<8x128xf32> to vector<8x64xf32>
    %282 = vector.extract_strided_slice %280 {offsets = [0, 0], sizes = [8, 64], strides = [1, 1]} : vector<8x128xf32> to vector<8x64xf32>
    %283 = arith.addf %281, %282 : vector<8x64xf32>
    %284 = arith.negf %283 : vector<8x64xf32>
    %285 = math.exp %284 : vector<8x64xf32>
    %cst_47 = arith.constant 1.000000e+00 : f32
    %286 = vector.broadcast %cst_47 : f32 to vector<8x64xf32>
    %287 = arith.addf %286, %285 : vector<8x64xf32>
    %288 = arith.divf %286, %287 : vector<8x64xf32>
    %289 = vector.extract_strided_slice %288 {offsets = [0, 0], sizes = [8, 32], strides = [1, 1]} : vector<8x64xf32> to vector<8x32xf32>
    %290 = vector.extract_strided_slice %288 {offsets = [0, 32], sizes = [8, 32], strides = [1, 1]} : vector<8x64xf32> to vector<8x32xf32>
    %291 = vector.extract_strided_slice %278 {offsets = [0, 64], sizes = [8, 32], strides = [1, 1]} : vector<8x128xf32> to vector<8x32xf32>
    %292 = vector.extract_strided_slice %280 {offsets = [0, 64], sizes = [8, 32], strides = [1, 1]} : vector<8x128xf32> to vector<8x32xf32>
    %293 = arith.mulf %289, %292 : vector<8x32xf32>
    %294 = arith.addf %291, %293 : vector<8x32xf32>
    %295 = math.tanh %294 : vector<8x32xf32>
    %c9_i32 = arith.constant 9 : i32
    %296 = vector.broadcast %c9_i32 : i32 to vector<8x1xi32>
    %297 = arith.cmpi sgt, %9, %296 : vector<8x1xi32>
    %cst_48 = arith.constant 1.000000e+00 : f32
    %298 = vector.shape_cast %297 : vector<8x1xi1> to vector<8x1xi1>
    %299 = vector.broadcast %298 : vector<8x1xi1> to vector<8x32xi1>
    %300 = vector.broadcast %cst_48 : f32 to vector<8x32xf32>
    %301 = arith.select %299, %290, %300 : vector<8x32xi1>, vector<8x32xf32>
    %cst_49 = arith.constant 1.000000e+00 : f32
    %302 = vector.broadcast %cst_49 : f32 to vector<8x32xf32>
    %303 = arith.subf %302, %301 : vector<8x32xf32>
    %304 = arith.mulf %303, %295 : vector<8x32xf32>
    %305 = arith.mulf %301, %277 : vector<8x32xf32>
    %306 = arith.addf %304, %305 : vector<8x32xf32>
    %307 = vector.extract_strided_slice %13 {offsets = [80, 0], sizes = [8, 128], strides = [1, 1]} : vector<96x128xf32> to vector<8x128xf32>
    %cst_50 = arith.constant dense<0.000000e+00> : vector<8x128xf32>
    %308 = tpu.matmul %306, %1, %cst_50 {dimension_numbers = #tpu.dot_dimension_numbers<[1], [0], [0], [1], [0, 0, 1, 1], [], []>} : vector<8x32xf32>, vector<32x128xf32>, vector<8x128xf32> -> vector<8x128xf32>
    %309 = arith.addf %308, %15 : vector<8x128xf32>
    %310 = vector.extract_strided_slice %307 {offsets = [0, 0], sizes = [8, 64], strides = [1, 1]} : vector<8x128xf32> to vector<8x64xf32>
    %311 = vector.extract_strided_slice %309 {offsets = [0, 0], sizes = [8, 64], strides = [1, 1]} : vector<8x128xf32> to vector<8x64xf32>
    %312 = arith.addf %310, %311 : vector<8x64xf32>
    %313 = arith.negf %312 : vector<8x64xf32>
    %314 = math.exp %313 : vector<8x64xf32>
    %cst_51 = arith.constant 1.000000e+00 : f32
    %315 = vector.broadcast %cst_51 : f32 to vector<8x64xf32>
    %316 = arith.addf %315, %314 : vector<8x64xf32>
    %317 = arith.divf %315, %316 : vector<8x64xf32>
    %318 = vector.extract_strided_slice %317 {offsets = [0, 0], sizes = [8, 32], strides = [1, 1]} : vector<8x64xf32> to vector<8x32xf32>
    %319 = vector.extract_strided_slice %317 {offsets = [0, 32], sizes = [8, 32], strides = [1, 1]} : vector<8x64xf32> to vector<8x32xf32>
    %320 = vector.extract_strided_slice %307 {offsets = [0, 64], sizes = [8, 32], strides = [1, 1]} : vector<8x128xf32> to vector<8x32xf32>
    %321 = vector.extract_strided_slice %309 {offsets = [0, 64], sizes = [8, 32], strides = [1, 1]} : vector<8x128xf32> to vector<8x32xf32>
    %322 = arith.mulf %318, %321 : vector<8x32xf32>
    %323 = arith.addf %320, %322 : vector<8x32xf32>
    %324 = math.tanh %323 : vector<8x32xf32>
    %c10_i32 = arith.constant 10 : i32
    %325 = vector.broadcast %c10_i32 : i32 to vector<8x1xi32>
    %326 = arith.cmpi sgt, %9, %325 : vector<8x1xi32>
    %cst_52 = arith.constant 1.000000e+00 : f32
    %327 = vector.shape_cast %326 : vector<8x1xi1> to vector<8x1xi1>
    %328 = vector.broadcast %327 : vector<8x1xi1> to vector<8x32xi1>
    %329 = vector.broadcast %cst_52 : f32 to vector<8x32xf32>
    %330 = arith.select %328, %319, %329 : vector<8x32xi1>, vector<8x32xf32>
    %cst_53 = arith.constant 1.000000e+00 : f32
    %331 = vector.broadcast %cst_53 : f32 to vector<8x32xf32>
    %332 = arith.subf %331, %330 : vector<8x32xf32>
    %333 = arith.mulf %332, %324 : vector<8x32xf32>
    %334 = arith.mulf %330, %306 : vector<8x32xf32>
    %335 = arith.addf %333, %334 : vector<8x32xf32>
    %336 = vector.extract_strided_slice %13 {offsets = [88, 0], sizes = [8, 128], strides = [1, 1]} : vector<96x128xf32> to vector<8x128xf32>
    %cst_54 = arith.constant dense<0.000000e+00> : vector<8x128xf32>
    %337 = tpu.matmul %335, %1, %cst_54 {dimension_numbers = #tpu.dot_dimension_numbers<[1], [0], [0], [1], [0, 0, 1, 1], [], []>} : vector<8x32xf32>, vector<32x128xf32>, vector<8x128xf32> -> vector<8x128xf32>
    %338 = arith.addf %337, %15 : vector<8x128xf32>
    %339 = vector.extract_strided_slice %336 {offsets = [0, 0], sizes = [8, 64], strides = [1, 1]} : vector<8x128xf32> to vector<8x64xf32>
    %340 = vector.extract_strided_slice %338 {offsets = [0, 0], sizes = [8, 64], strides = [1, 1]} : vector<8x128xf32> to vector<8x64xf32>
    %341 = arith.addf %339, %340 : vector<8x64xf32>
    %342 = arith.negf %341 : vector<8x64xf32>
    %343 = math.exp %342 : vector<8x64xf32>
    %cst_55 = arith.constant 1.000000e+00 : f32
    %344 = vector.broadcast %cst_55 : f32 to vector<8x64xf32>
    %345 = arith.addf %344, %343 : vector<8x64xf32>
    %346 = arith.divf %344, %345 : vector<8x64xf32>
    %347 = vector.extract_strided_slice %346 {offsets = [0, 0], sizes = [8, 32], strides = [1, 1]} : vector<8x64xf32> to vector<8x32xf32>
    %348 = vector.extract_strided_slice %346 {offsets = [0, 32], sizes = [8, 32], strides = [1, 1]} : vector<8x64xf32> to vector<8x32xf32>
    %349 = vector.extract_strided_slice %336 {offsets = [0, 64], sizes = [8, 32], strides = [1, 1]} : vector<8x128xf32> to vector<8x32xf32>
    %350 = vector.extract_strided_slice %338 {offsets = [0, 64], sizes = [8, 32], strides = [1, 1]} : vector<8x128xf32> to vector<8x32xf32>
    %351 = arith.mulf %347, %350 : vector<8x32xf32>
    %352 = arith.addf %349, %351 : vector<8x32xf32>
    %353 = math.tanh %352 : vector<8x32xf32>
    %c11_i32 = arith.constant 11 : i32
    %354 = vector.broadcast %c11_i32 : i32 to vector<8x1xi32>
    %355 = arith.cmpi sgt, %9, %354 : vector<8x1xi32>
    %cst_56 = arith.constant 1.000000e+00 : f32
    %356 = vector.shape_cast %355 : vector<8x1xi1> to vector<8x1xi1>
    %357 = vector.broadcast %356 : vector<8x1xi1> to vector<8x32xi1>
    %358 = vector.broadcast %cst_56 : f32 to vector<8x32xf32>
    %359 = arith.select %357, %348, %358 : vector<8x32xi1>, vector<8x32xf32>
    %cst_57 = arith.constant 1.000000e+00 : f32
    %360 = vector.broadcast %cst_57 : f32 to vector<8x32xf32>
    %361 = arith.subf %360, %359 : vector<8x32xf32>
    %362 = arith.mulf %361, %353 : vector<8x32xf32>
    %363 = arith.mulf %359, %335 : vector<8x32xf32>
    %364 = arith.addf %362, %363 : vector<8x32xf32>
    %cst_58 = arith.constant dense<0.000000e+00> : vector<8x128xf32>
    %365 = tpu.matmul %364, %3, %cst_58 {dimension_numbers = #tpu.dot_dimension_numbers<[1], [0], [0], [1], [0, 0, 1, 1], [], []>} : vector<8x32xf32>, vector<32x128xf32>, vector<8x128xf32> -> vector<8x128xf32>
    %366 = vector.broadcast %7 : vector<1x128xf32> to vector<8x128xf32>
    %367 = arith.addf %365, %366 : vector<8x128xf32>
    %cst_59 = arith.constant 0.000000e+00 : f32
    %368 = vector.broadcast %cst_59 : f32 to vector<8x128xf32>
    %369 = arith.maximumf %367, %368 : vector<8x128xf32>
    %370 = vector.extract_strided_slice %369 {offsets = [0, 0], sizes = [8, 32], strides = [1, 1]} : vector<8x128xf32> to vector<8x32xf32>
    %cst_60 = arith.constant dense<0.000000e+00> : vector<8x128xf32>
    %371 = tpu.matmul %370, %4, %cst_60 {dimension_numbers = #tpu.dot_dimension_numbers<[1], [0], [0], [1], [0, 0, 1, 1], [], []>} : vector<8x32xf32>, vector<32x128xf32>, vector<8x128xf32> -> vector<8x128xf32>
    %372 = vector.broadcast %8 : vector<1x128xf32> to vector<8x128xf32>
    %373 = arith.addf %371, %372 : vector<8x128xf32>
    %c0_61 = arith.constant 0 : index
    %c0_62 = arith.constant 0 : index
    %374 = vector.load %arg3[%c0_61, %c0_62] : memref<8x128xf32, #tpu.memory_space<vmem>>, vector<8x128xf32>
    tpu.vector_store %arg3[%c0_61, %c0_62], %373 {strides = array<i32>} : memref<8x128xf32, #tpu.memory_space<vmem>>, vector<8x128xf32>,
    return
  }
}

</mosaic_0001>

<bundles_post_ra>
// kernel: tpu_custom_call.1
= control target key start
LH: loop header
LB: loop body
LE: loop exit
PB: predicated region body
PF: predicated region fallthrough
CT: control target
= control target key end

     0   :  { %vm44_vm0 = vcmask 130048   ;;  %v1203_v5 = vmov 0   ;;  %s1520_s0 = inlined_call_operand.vmem [shape: s32[8,1], index: 0, kind: input, shape index: {}]   ;;  %s1521_s1 = inlined_call_operand.vmem [shape: f32[96,16], index: 1, kind: input, shape index: {}]   ;;  %s1522_s2 = inlined_call_operand.vmem [shape: f32[120,128], index: 2, kind: input, shape index: {}]   ;;  %s1523_s3 = inlined_call_operand.hbm [shape: f32[8,128], index: 3, kind: output, shape index: {}]  }
   0x1   :  { %v16_v0 = vld [vmem:[%s1522_s2 + $0x8] sm:$0xff]  ;;  %v15_v1 = vld [vmem:[%s1522_s2] sm:$0xff]  ;;  %v38_v2 = vld [vmem:[%s1521_s1 + $0x38] sm:$0xff]  ;;  %1100 = vset.pattern.permute.xlu1 %v1203_v5 }
   0x2   :  { %1091 = vmatpush.msra.mxu1 %v16_v0  ;;  %v1240_v3 = vld [vmem:[%s1522_s2 + $0x28] sm:$0xff]  ;;  %95 = vmatpush.msra.mxu0 %v16_v0  ;;  %v31_v4 = vld [vmem:[%s1521_s1] sm:$0xff] }
   0x3   :  { %222 = vmatpush.msra.mxu2 %v1240_v3  ;;  %v1250_v6 = vld [vmem:[%s1520_s0] sm:$0xff] }
   0x4   :  { %1093 = vmatpush.msra.mxu1 %v15_v1  ;;  %96 = vmatpush.msra.mxu0 %v15_v1 }
   0x5   :  { %8 = vsyncpa [#allocation3], 0  ;;  %1061 = vmatmul.msk.f32.vlgmr.msra.gmra.mxu1 %vm44_vm0, %v38_v2  ;;  %v1256_v7 = vld [vmem:[%s1522_s2 + $0x20] sm:$0xff]  ;;  %1054 = vmatmul.msk.f32.vlgmr.msra.gmra.mxu0 %vm44_vm0, %v31_v4  ;;  %vm190_vm1 = vcmp.gt.s32.totalorder %v1250_v6, 0  ;;  %v1266_v9 = vld [vmem:[%s1522_s2 + $0x18] sm:$0xff]  ;;  %v1204_v12 = vmov 0.0  }
   0x6   :  { %151 = vmatpush.msrb.mxu1 %v1240_v3  ;;  %v191_v8 = vsel %vm190_vm1, 1, %v1203_v5  ;;  %223 = vmatpush.msra.mxu2 %v1256_v7  ;;  %v1273_v10 = vld [vmem:[%s1522_s2 + $0x10] sm:$0xff]  ;;  %v39_v11 = vld [vmem:[%s1521_s1 + $0x40] sm:$0xff]  ;;  %s1205_s7 = smov 64   ;;  %s1206_s8 = smov 96   ;;  %vm261_vm6 = vcmp.gt.s32.totalorder %v1250_v6, 1 }
   0x7   :  { %193 = vperm.xlu1 %1100, %v191_v8   ;;  %1092 = vmatpush.msra.mxu3 %v16_v0  ;;  %v21_v15 = vld [vmem:[%s1522_s2 + $0x30] sm:$0xff]  ;;  %v262_v41 = vsel %vm261_vm6, 1, %v1203_v5  ;;  %v32_v49 = vld [vmem:[%s1521_s1 + $0x8] sm:$0xff]  ;;  %vm135_vm8 = vcmask 261120   ;;  %vm332_vm14 = vcmp.gt.s32.totalorder %v1250_v6, 2  ;;  %s1207_s18 = smov [#allocation2]  }
   0x8   :  { %152 = vmatpush.msrb.mxu1 %v1256_v7  ;;  %224 = vmatpush.msra.mxu2 %v1266_v9  ;;  %v1307_v16 = vperm.slane %v21_v15, 1  ;;  %v1311_v20 = vperm.slane %v21_v15, 0  ;;  %s1043_s19 = sshll.u32 %s1207_s18, 4  ;;  %s1045_s22 = sshll.u32 %s1523_s3, 4  ;;  %s1044_s19 = int_to_ptr.vmem [resolvable:$true] %s1043_s19  ;;  %s1046_s22 = int_to_ptr.hbm [resolvable:$true] %s1045_s22 }
   0x9   :  { %1094 = vmatpush.msra.mxu3 %v15_v1  ;;  %1101 = vset.pattern.permute.xlu0 %v1203_v5 }
   0xa   :  { %153 = vmatpush.msrb.mxu1 %v1266_v9  ;;  %225 = vmatpush.msra.mxu2 %v1273_v10 }
   0xb   :  { %293 = vmatpush.msrb.mxu3 %v1240_v3  ;;  %1102 = vset.pattern.permute.xlu2 %v1203_v5 }
   0xc   :  { %435 = vmatpush.msrb.mxu2 %v1240_v3  ;;  %154 = vmatpush.msrb.mxu1 %v1273_v10 }
   0xd   :  { %1062 = vmatmul.msk.f32.gmra.mxu1 %vm44_vm0, %v39_v11  ;;  %294 = vmatpush.msrb.mxu3 %v1256_v7 }
   0xe   :  { %364 = vmatpush.msra.mxu1 %v1240_v3  ;;  %436 = vmatpush.msrb.mxu2 %v1256_v7 }
   0xf   :  { %295 = vmatpush.msrb.mxu3 %v1266_v9  ;;  %1055 = vmatmul.msk.f32.gmra.mxu0 %vm44_vm0, %v32_v49 }
  0x10   :  { %365 = vmatpush.msra.mxu1 %v1256_v7  ;;  %437 = vmatpush.msrb.mxu2 %v1266_v9 }
  0x11   :  { %296 = vmatpush.msrb.mxu3 %v1273_v10 }
  0x12   :  { %366 = vmatpush.msra.mxu1 %v1266_v9  ;;  %438 = vmatpush.msrb.mxu2 %v1273_v10 }
  0x14   :  { %367 = vmatpush.msra.mxu1 %v1273_v10 }
  0x15   :  { %155 = vmatmul.f32.vlgmr.msrb.gmra.mxu1 %v1204_v12 }
  0x16   :  { %577 = vmatpush.msrb.mxu1 %v1240_v3 }
  0x18   :  { %578 = vmatpush.msrb.mxu1 %v1256_v7 }
  0x1a   :  { %579 = vmatpush.msrb.mxu1 %v1266_v9 }
  0x1c   :  { %580 = vmatpush.msrb.mxu1 %v1273_v10 }
  0x79   :  { %v194_v42 = vpop.permute.xlu1 %193 }
  0x7a   :  { %vm195_vm7 = vcmp.eq.s32.totalorder %v194_v42, 1 }
  0x82   :  { %v1300_v13 = vpop.f32.mrf.mxu1  ;;  %v98_v19 = vpop.f32.mrf.mxu0 }
  0x83   :  { %v99_v21 = vadd.f32 %v98_v19, %v1311_v20  ;;  %v40_v19 = vld [vmem:[%s1521_s1 + $0x48] sm:$0xff] }
  0x84   :  { %1063 = vmatmul.msk.f32.vlgmr.msra.gmra.mxu3 %vm44_vm0, %v40_v19 }
  0x85   :  { %506 = vmatpush.msra.mxu3 %v1240_v3 }
  0x87   :  { %507 = vmatpush.msra.mxu3 %v1256_v7 }
  0x89   :  { %508 = vmatpush.msra.mxu3 %v1266_v9 }
  0x8a   :  { %v1302_v14 = vpop.f32.mrf.mxu1 }
  0x8b   :  { %509 = vmatpush.msra.mxu3 %v1273_v10 }
  0x8c   :  { %v101_v53 = vpop.f32.mrf.mxu0 }
  0x8d   :  { %v102_v54 = vadd.f32 %v101_v53, %v1311_v20 }
  0x92   :  { %v156_v17 = vpop.f32.mrf.mxu1 }
  0x93   :  { %v157_v18 = vadd.f32 %v156_v17, %v1307_v16 }
  0x95   :  { %180 = vrot.lane.b32.xlu0 %v157_v18, %s1205_s7  ;;  %v159_v22 = vadd.f32 %v157_v18, %v99_v21 }
  0x97   :  { %v1066_v23 = vmul.f32 -1.442695, %v159_v22  ;;  %v42_v22 = vld [vmem:[%s1521_s1 + $0x58] sm:$0xff] }
  0x99   :  { %1103 = vpow2.f32 %v1066_v23 }
  0x9f   :  { %v1104_v24 = vpop.eup %1103 }
  0xa0   :  { %v163_v25 = vadd.f32 1.0, %v1104_v24 }
  0xa2   :  { %1105 = vrcp.f32 %v163_v25  ;;  %v175_v31 = vand.u32 2147483648, %v163_v25  ;;  %vm169_vm3 = vweird.f32 %v163_v25  ;;  %v173_v32 = vand.u32 2147483647, %v163_v25 }
  0xa4   :  { %v176_v34 = vor.u32 1.1754944e-38, %v175_v31  ;;  %vm174_vm5 = vcmp.eq.f32.partialorder %v173_v32, 8.507059e+37  ;;  %v333_v31 = vsel %vm332_vm14, 1, %v1203_v5 }
  0xa8   :  { %v1106_v26 = vpop.eup %1105 }
  0xa9   :  { %v165_v27 = vmul.f32 %v1106_v26, %v163_v25  ;;  %vm170_vm2 = vweird.f32 %v1106_v26 }
  0xaa   :  { %vm171_vm4 = vmor %vm169_vm3, %vm170_vm2 }
  0xab   :  { %v166_v28 = vsub.f32 1.0, %v165_v27 }
  0xad   :  { %v167_v29 = vmul.f32 %v1106_v26, %v166_v28 }
  0xaf   :  { %v168_v30 = vadd.f32 %v1106_v26, %v167_v29 }
  0xb1   :  { %v172_v33 = vsel %vm171_vm4, %v1106_v26, %v168_v30  ;;  %v33_v30 = vld [vmem:[%s1521_s1 + $0x10] sm:$0xff]  ;;  %vm403_vm4 = vcmp.gt.s32.totalorder %v1250_v6, 3 }
  0xb2   :  { %v177_v35 = vsel %vm174_vm5, %v176_v34, %v172_v33  ;;  %1056 = vmatmul.msk.f32.gmra.mxu0 %vm44_vm0, %v33_v30 }
  0xb3   :  { %v196_v43 = vsel %vm195_vm7, %v177_v35, 1.0 }
  0xb4   :  { %v197_v44 = vsub.f32 1.0, %v196_v43  ;;  %v203_v46 = vmul.f32 0.0, %v196_v43 }
 0x107   :  { %v181_v36 = vpop.permute.xlu0 %180  ;;  %v1361_v33 = vpop.f32.mrf.mxu3 }
 0x108   :  { %v183_v37 = vmul.f32 %v181_v36, %v177_v35 }
 0x10a   :  { %185 = vrot.lane.b32.xlu0 %v183_v37, %s1205_s7 }
 0x17c   :  { %v186_v38 = vpop.permute.xlu0 %185 }
 0x17d   :  { %v188_v39 = vadd.f32 %v186_v38, %v99_v21  ;;  %v41_v21 = vld [vmem:[%s1521_s1 + $0x50] sm:$0xff]  ;;  %v104_v38 = vpop.f32.mrf.mxu0 }
 0x17e   :  { %1064 = vmatmul.msk.f32.gmra.mxu3 %vm44_vm0, %v41_v21 }
 0x17f   :  { %1107 = vtanh.f32 %v188_v39  ;;  %v105_v39 = vadd.f32 %v104_v38, %v1311_v20 }
 0x185   :  { %v1108_v40 = vpop.eup %1107 }
 0x186   :  { %199 = vrot.lane.b32.xlu1 %v1108_v40, %s1206_s8  ;;  %1065 = vmatmul.msk.f32.gmra.mxu3 %vm44_vm0, %v42_v22 }
 0x18e   :  { %264 = vperm.xlu1 %1100, %v262_v41  }
 0x1f8   :  { %v200_v45 = vpop.permute.xlu1 %199 }
 0x1f9   :  { %v202_v47 = vmul.f32 %v200_v45, %v197_v44 }
 0x1fb   :  { %v204_v48 = vadd.f32 %v203_v46, %v202_v47 }
 0x1fd   :  { %206 = vrot.lane.b32.xlu2 %v204_v48, %s1206_s8 }
 0x200   :  { %v265_v23 = vpop.permute.xlu1 %264 }
 0x201   :  { %vm266_vm13 = vcmp.eq.s32.totalorder %v265_v23, 1  ;;  %v1363_v34 = vpop.f32.mrf.mxu3 }
 0x209   :  { %v1365_v35 = vpop.f32.mrf.mxu3 }
 0x257   :  { %v207_v50 = vpop.permute.xlu2 %206 }
 0x258   :  { %1067 = vmatmul.msk.f32.vlgmr.msra.gmra.mxu2 %vm135_vm8, %v207_v50 }
 0x259   :  { %648 = vmatpush.msra.mxu2 %v1240_v3 }
 0x25b   :  { %649 = vmatpush.msra.mxu2 %v1256_v7 }
 0x25d   :  { %650 = vmatpush.msra.mxu2 %v1266_v9 }
 0x25f   :  { %651 = vmatpush.msra.mxu2 %v1273_v10 }
 0x2db   :  { %v227_v51 = vpop.f32.mrf.mxu2 }
 0x2dc   :  { %v228_v52 = vadd.f32 %v227_v51, %v1307_v16 }
 0x2de   :  { %251 = vrot.lane.b32.xlu2 %v228_v52, %s1205_s7  ;;  %v230_v55 = vadd.f32 %v228_v52, %v102_v54 }
 0x2e0   :  { %v1068_v56 = vmul.f32 -1.442695, %v230_v55 }
 0x2e2   :  { %1109 = vpow2.f32 %v1068_v56  ;;  %v404_v56 = vsel %vm403_vm4, 1, %v1203_v5 }
 0x2e8   :  { %v1110_v57 = vpop.eup %1109 }
 0x2e9   :  { %v234_v58 = vadd.f32 1.0, %v1110_v57 }
 0x2eb   :  { %1111 = vrcp.f32 %v234_v58  ;;  %v246_v0 = vand.u32 2147483648, %v234_v58  ;;  %vm240_vm10 = vweird.f32 %v234_v58  ;;  %v244_v1 = vand.u32 2147483647, %v234_v58 }
 0x2ed   :  { %v247_v4 = vor.u32 1.1754944e-38, %v246_v0  ;;  %vm245_vm12 = vcmp.eq.f32.partialorder %v244_v1, 8.507059e+37 }
 0x2f1   :  { %v1112_v59 = vpop.eup %1111 }
 0x2f2   :  { %v236_v60 = vmul.f32 %v1112_v59, %v234_v58  ;;  %vm241_vm9 = vweird.f32 %v1112_v59 }
 0x2f3   :  { %vm242_vm11 = vmor %vm240_vm10, %vm241_vm9 }
 0x2f4   :  { %v237_v61 = vsub.f32 1.0, %v236_v60 }
 0x2f6   :  { %v238_v62 = vmul.f32 %v1112_v59, %v237_v61 }
 0x2f8   :  { %v239_v63 = vadd.f32 %v1112_v59, %v238_v62 }
 0x2fa   :  { %v243_v2 = vsel %vm242_vm11, %v1112_v59, %v239_v63 }
 0x2fb   :  { %v248_v11 = vsel %vm245_vm12, %v247_v4, %v243_v2  ;;  %v34_v4 = vld [vmem:[%s1521_s1 + $0x18] sm:$0xff]  ;;  %vm474_vm12 = vcmp.gt.s32.totalorder %v1250_v6, 4 }
 0x2fc   :  { %v267_v24 = vsel %vm266_vm13, %v248_v11, 1.0  ;;  %1057 = vmatmul.msk.f32.gmra.mxu0 %vm44_vm0, %v34_v4 }
 0x2fd   :  { %v268_v25 = vsub.f32 1.0, %v267_v24  ;;  %v274_v27 = vmul.f32 %v267_v24, %v204_v48 }
 0x338   :  { %v252_v8 = vpop.permute.xlu2 %251 }
 0x339   :  { %v254_v12 = vmul.f32 %v252_v8, %v248_v11 }
 0x33b   :  { %256 = vrot.lane.b32.xlu0 %v254_v12, %s1205_s7 }
 0x3ad   :  { %v257_v15 = vpop.permute.xlu0 %256 }
 0x3ae   :  { %v259_v17 = vadd.f32 %v257_v15, %v102_v54  ;;  %v107_v15 = vpop.f32.mrf.mxu0 }
 0x3b0   :  { %1113 = vtanh.f32 %v259_v17  ;;  %v108_v17 = vadd.f32 %v107_v15, %v1311_v20 }
 0x3b6   :  { %v1114_v18 = vpop.eup %1113 }
 0x3b7   :  { %270 = vrot.lane.b32.xlu2 %v1114_v18, %s1206_s8 }
 0x411   :  { %v271_v26 = vpop.permute.xlu2 %270 }
 0x412   :  { %v273_v28 = vmul.f32 %v271_v26, %v268_v25 }
 0x414   :  { %v275_v29 = vadd.f32 %v274_v27, %v273_v28 }
 0x416   :  { %277 = vrot.lane.b32.xlu0 %v275_v29, %s1206_s8 }
 0x41e   :  { %335 = vperm.xlu0 %1101, %v333_v31  }
 0x426   :  { %406 = vperm.xlu0 %1101, %v404_v56  }
 0x488   :  { %v278_v32 = vpop.permute.xlu0 %277 }
 0x489   :  { %1069 = vmatmul.msk.f32.vlgmr.msrb.gmra.mxu3 %vm135_vm8, %v278_v32 }
 0x48a   :  { %719 = vmatpush.msrb.mxu3 %v1240_v3 }
 0x48c   :  { %720 = vmatpush.msrb.mxu3 %v1256_v7 }
 0x48e   :  { %721 = vmatpush.msrb.mxu3 %v1266_v9 }
 0x490   :  { %722 = vmatpush.msrb.mxu3 %v1273_v10  ;;  %v336_v60 = vpop.permute.xlu0 %335 }
 0x491   :  { %vm337_vm5 = vcmp.eq.s32.totalorder %v336_v60, 1 }
 0x50c   :  { %v298_v36 = vpop.f32.mrf.mxu3 }
 0x50d   :  { %v299_v37 = vadd.f32 %v298_v36, %v1307_v16 }
 0x50f   :  { %322 = vrot.lane.b32.xlu1 %v299_v37, %s1205_s7  ;;  %v301_v40 = vadd.f32 %v299_v37, %v105_v39 }
 0x511   :  { %v1070_v41 = vmul.f32 -1.442695, %v301_v40 }
 0x513   :  { %1115 = vpow2.f32 %v1070_v41  ;;  %v407_v41 = vpop.permute.xlu0 %406 }
 0x514   :  { %vm408_vm11 = vcmp.eq.s32.totalorder %v407_v41, 1 }
 0x519   :  { %v1116_v42 = vpop.eup %1115 }
 0x51a   :  { %v305_v43 = vadd.f32 1.0, %v1116_v42 }
 0x51c   :  { %1117 = vrcp.f32 %v305_v43  ;;  %v317_v49 = vand.u32 2147483648, %v305_v43  ;;  %vm311_vm1 = vweird.f32 %v305_v43  ;;  %v315_v50 = vand.u32 2147483647, %v305_v43 }
 0x51e   :  { %v318_v52 = vor.u32 1.1754944e-38, %v317_v49  ;;  %vm316_vm3 = vcmp.eq.f32.partialorder %v315_v50, 8.507059e+37  ;;  %v475_v49 = vsel %vm474_vm12, 1, %v1203_v5 }
 0x522   :  { %v1118_v44 = vpop.eup %1117 }
 0x523   :  { %v307_v45 = vmul.f32 %v1118_v44, %v305_v43  ;;  %vm312_vm15 = vweird.f32 %v1118_v44 }
 0x524   :  { %vm313_vm2 = vmor %vm311_vm1, %vm312_vm15 }
 0x525   :  { %v308_v46 = vsub.f32 1.0, %v307_v45 }
 0x527   :  { %v309_v47 = vmul.f32 %v1118_v44, %v308_v46 }
 0x529   :  { %v310_v48 = vadd.f32 %v1118_v44, %v309_v47 }
 0x52b   :  { %v314_v51 = vsel %vm313_vm2, %v1118_v44, %v310_v48  ;;  %v35_v48 = vld [vmem:[%s1521_s1 + $0x20] sm:$0xff] }
 0x52c   :  { %v319_v53 = vsel %vm316_vm3, %v318_v52, %v314_v51  ;;  %1058 = vmatmul.msk.f32.gmra.mxu0 %vm44_vm0, %v35_v48  ;;  %vm545_vm3 = vcmp.gt.s32.totalorder %v1250_v6, 5 }
 0x52d   :  { %v338_v61 = vsel %vm337_vm5, %v319_v53, 1.0 }
 0x52e   :  { %v339_v62 = vsub.f32 1.0, %v338_v61  ;;  %v345_v0 = vmul.f32 %v338_v61, %v275_v29 }
 0x581   :  { %v323_v54 = vpop.permute.xlu1 %322 }
 0x582   :  { %v325_v55 = vmul.f32 %v323_v54, %v319_v53 }
 0x584   :  { %327 = vrot.lane.b32.xlu2 %v325_v55, %s1205_s7 }
 0x5a9   :  { %v110_v53 = vpop.f32.mrf.mxu0 }
 0x5aa   :  { %v111_v54 = vadd.f32 %v110_v53, %v1311_v20 }
 0x5de   :  { %v328_v57 = vpop.permute.xlu2 %327 }
 0x5df   :  { %v330_v58 = vadd.f32 %v328_v57, %v105_v39 }
 0x5e1   :  { %1119 = vtanh.f32 %v330_v58 }
 0x5e7   :  { %v1120_v59 = vpop.eup %1119 }
 0x5e8   :  { %341 = vrot.lane.b32.xlu1 %v1120_v59, %s1206_s8 }
 0x65a   :  { %v342_v63 = vpop.permute.xlu1 %341 }
 0x65b   :  { %v344_v1 = vmul.f32 %v342_v63, %v339_v62 }
 0x65d   :  { %v346_v2 = vadd.f32 %v345_v0, %v344_v1 }
 0x65f   :  { %348 = vrot.lane.b32.xlu2 %v346_v2, %s1206_s8 }
 0x6b9   :  { %v349_v8 = vpop.permute.xlu2 %348 }
 0x6ba   :  { %1071 = vmatmul.msk.f32.vlgmr.msra.gmra.mxu1 %vm135_vm8, %v349_v8 }
 0x6bb   :  { %790 = vmatpush.msra.mxu1 %v1240_v3 }
 0x6bd   :  { %791 = vmatpush.msra.mxu1 %v1256_v7 }
 0x6bf   :  { %792 = vmatpush.msra.mxu1 %v1266_v9 }
 0x6c1   :  { %793 = vmatpush.msra.mxu1 %v1273_v10 }
 0x737   :  { %v369_v11 = vpop.f32.mrf.mxu1 }
 0x738   :  { %v370_v12 = vadd.f32 %v369_v11, %v1307_v16 }
 0x73a   :  { %393 = vrot.lane.b32.xlu1 %v370_v12, %s1205_s7  ;;  %v372_v18 = vadd.f32 %v370_v12, %v108_v17 }
 0x73c   :  { %v1072_v19 = vmul.f32 -1.442695, %v372_v18 }
 0x73e   :  { %1121 = vpow2.f32 %v1072_v19 }
 0x744   :  { %v1122_v21 = vpop.eup %1121 }
 0x745   :  { %v376_v22 = vadd.f32 1.0, %v1122_v21 }
 0x747   :  { %1123 = vrcp.f32 %v376_v22  ;;  %v388_v28 = vand.u32 2147483648, %v376_v22  ;;  %vm382_vm7 = vweird.f32 %v376_v22  ;;  %v386_v29 = vand.u32 2147483647, %v376_v22 }
 0x749   :  { %v389_v31 = vor.u32 1.1754944e-38, %v388_v28  ;;  %vm387_vm10 = vcmp.eq.f32.partialorder %v386_v29, 8.507059e+37  ;;  %v36_v28 = vld [vmem:[%s1521_s1 + $0x28] sm:$0xff] }
 0x74a   :  { %1059 = vmatmul.msk.f32.gmra.mxu0 %vm44_vm0, %v36_v28 }
 0x74d   :  { %v1124_v23 = vpop.eup %1123 }
 0x74e   :  { %v378_v24 = vmul.f32 %v1124_v23, %v376_v22  ;;  %vm383_vm6 = vweird.f32 %v1124_v23 }
 0x74f   :  { %vm384_vm9 = vmor %vm382_vm7, %vm383_vm6 }
 0x750   :  { %v379_v25 = vsub.f32 1.0, %v378_v24 }
 0x752   :  { %v380_v26 = vmul.f32 %v1124_v23, %v379_v25 }
 0x754   :  { %v381_v27 = vadd.f32 %v1124_v23, %v380_v26 }
 0x756   :  { %v385_v30 = vsel %vm384_vm9, %v1124_v23, %v381_v27  ;;  %v546_v27 = vsel %vm545_vm3, 1, %v1203_v5 }
 0x757   :  { %v390_v36 = vsel %vm387_vm10, %v389_v31, %v385_v30  ;;  %vm616_vm10 = vcmp.gt.s32.totalorder %v1250_v6, 6 }
 0x758   :  { %v409_v42 = vsel %vm408_vm11, %v390_v36, 1.0 }
 0x759   :  { %v410_v43 = vsub.f32 1.0, %v409_v42  ;;  %v416_v45 = vmul.f32 %v409_v42, %v346_v2 }
 0x7ac   :  { %v394_v32 = vpop.permute.xlu1 %393 }
 0x7ad   :  { %v396_v37 = vmul.f32 %v394_v32, %v390_v36 }
 0x7af   :  { %398 = vrot.lane.b32.xlu2 %v396_v37, %s1205_s7 }
 0x7c7   :  { %v113_v32 = vpop.f32.mrf.mxu0 }
 0x7c8   :  { %v114_v36 = vadd.f32 %v113_v32, %v1311_v20 }
 0x809   :  { %v399_v38 = vpop.permute.xlu2 %398 }
 0x80a   :  { %v401_v39 = vadd.f32 %v399_v38, %v108_v17 }
 0x80c   :  { %1125 = vtanh.f32 %v401_v39 }
 0x812   :  { %v1126_v40 = vpop.eup %1125 }
 0x813   :  { %412 = vrot.lane.b32.xlu1 %v1126_v40, %s1206_s8 }
 0x885   :  { %v413_v44 = vpop.permute.xlu1 %412 }
 0x886   :  { %v415_v46 = vmul.f32 %v413_v44, %v410_v43 }
 0x888   :  { %v417_v47 = vadd.f32 %v416_v45, %v415_v46 }
 0x88a   :  { %419 = vrot.lane.b32.xlu2 %v417_v47, %s1206_s8 }
 0x892   :  { %477 = vperm.xlu2 %1102, %v475_v49  }
 0x8e4   :  { %v420_v50 = vpop.permute.xlu2 %419 }
 0x8e5   :  { %1073 = vmatmul.msk.f32.vlgmr.msrb.gmra.mxu2 %vm135_vm8, %v420_v50 }
 0x8e6   :  { %861 = vmatpush.msrb.mxu2 %v1240_v3 }
 0x8e8   :  { %862 = vmatpush.msrb.mxu2 %v1256_v7 }
 0x8ea   :  { %863 = vmatpush.msrb.mxu2 %v1266_v9 }
 0x8ec   :  { %864 = vmatpush.msrb.mxu2 %v1273_v10  ;;  %v478_v19 = vpop.permute.xlu2 %477 }
 0x8ed   :  { %vm479_vm2 = vcmp.eq.s32.totalorder %v478_v19, 1 }
 0x968   :  { %v440_v51 = vpop.f32.mrf.mxu2 }
 0x969   :  { %v441_v52 = vadd.f32 %v440_v51, %v1307_v16 }
 0x96b   :  { %464 = vrot.lane.b32.xlu0 %v441_v52, %s1205_s7  ;;  %v443_v55 = vadd.f32 %v441_v52, %v111_v54 }
 0x96d   :  { %v1074_v56 = vmul.f32 -1.442695, %v443_v55 }
 0x96f   :  { %1127 = vpow2.f32 %v1074_v56 }
 0x975   :  { %v1128_v57 = vpop.eup %1127 }
 0x976   :  { %v447_v58 = vadd.f32 1.0, %v1128_v57 }
 0x978   :  { %1129 = vrcp.f32 %v447_v58  ;;  %v459_v0 = vand.u32 2147483648, %v447_v58  ;;  %vm453_vm14 = vweird.f32 %v447_v58  ;;  %v457_v1 = vand.u32 2147483647, %v447_v58 }
 0x97a   :  { %v460_v4 = vor.u32 1.1754944e-38, %v459_v0  ;;  %vm458_vm1 = vcmp.eq.f32.partialorder %v457_v1, 8.507059e+37 }
 0x97e   :  { %v1130_v59 = vpop.eup %1129 }
 0x97f   :  { %v449_v60 = vmul.f32 %v1130_v59, %v447_v58  ;;  %vm454_vm13 = vweird.f32 %v1130_v59 }
 0x980   :  { %vm455_vm15 = vmor %vm453_vm14, %vm454_vm13 }
 0x981   :  { %v450_v61 = vsub.f32 1.0, %v449_v60  ;;  %v37_v60 = vld [vmem:[%s1521_s1 + $0x30] sm:$0xff] }
 0x982   :  { %1060 = vmatmul.msk.f32.gmra.mxu0 %vm44_vm0, %v37_v60 }
 0x983   :  { %v451_v62 = vmul.f32 %v1130_v59, %v450_v61 }
 0x985   :  { %v452_v63 = vadd.f32 %v1130_v59, %v451_v62 }
 0x987   :  { %v456_v2 = vsel %vm455_vm15, %v1130_v59, %v452_v63  ;;  %v617_v59 = vsel %vm616_vm10, 1, %v1203_v5  ;;  %vm687_vm15 = vcmp.gt.s32.totalorder %v1250_v6, 7 }
 0x988   :  { %v461_v8 = vsel %vm458_vm1, %v460_v4, %v456_v2 }
 0x989   :  { %v480_v21 = vsel %vm479_vm2, %v461_v8, 1.0 }
 0x98a   :  { %v481_v22 = vsub.f32 1.0, %v480_v21  ;;  %v487_v24 = vmul.f32 %v480_v21, %v417_v47 }
 0x9dd   :  { %v465_v11 = vpop.permute.xlu0 %464 }
 0x9de   :  { %v467_v12 = vmul.f32 %v465_v11, %v461_v8 }
 0x9e0   :  { %469 = vrot.lane.b32.xlu1 %v467_v12, %s1205_s7 }
 0x9ff   :  { %v116_v0 = vpop.f32.mrf.mxu0 }
 0xa00   :  { %v117_v1 = vadd.f32 %v116_v0, %v1311_v20 }
 0xa52   :  { %v470_v15 = vpop.permute.xlu1 %469 }
 0xa53   :  { %v472_v17 = vadd.f32 %v470_v15, %v111_v54 }
 0xa55   :  { %1131 = vtanh.f32 %v472_v17 }
 0xa5b   :  { %v1132_v18 = vpop.eup %1131 }
 0xa5c   :  { %483 = vrot.lane.b32.xlu0 %v1132_v18, %s1206_s8 }
 0xace   :  { %v484_v23 = vpop.permute.xlu0 %483 }
 0xacf   :  { %v486_v25 = vmul.f32 %v484_v23, %v481_v22 }
 0xad1   :  { %v488_v26 = vadd.f32 %v487_v24, %v486_v25 }
 0xad3   :  { %490 = vrot.lane.b32.xlu1 %v488_v26, %s1206_s8 }
 0xadb   :  { %548 = vperm.xlu1 %1100, %v546_v27  }
 0xb45   :  { %v491_v29 = vpop.permute.xlu1 %490 }
 0xb46   :  { %1075 = vmatmul.msk.f32.vlgmr.msra.gmra.mxu3 %vm135_vm8, %v491_v29 }
 0xb47   :  { %932 = vmatpush.msra.mxu3 %v1240_v3 }
 0xb49   :  { %933 = vmatpush.msra.mxu3 %v1256_v7 }
 0xb4b   :  { %934 = vmatpush.msra.mxu3 %v1266_v9 }
 0xb4d   :  { %935 = vmatpush.msra.mxu3 %v1273_v10  ;;  %v549_v52 = vpop.permute.xlu1 %548 }
 0xb4e   :  { %vm550_vm9 = vcmp.eq.s32.totalorder %v549_v52, 1 }
 0xbc9   :  { %v511_v30 = vpop.f32.mrf.mxu3 }
 0xbca   :  { %v512_v31 = vadd.f32 %v511_v30, %v1307_v16 }
 0xbcc   :  { %535 = vrot.lane.b32.xlu2 %v512_v31, %s1205_s7  ;;  %v514_v37 = vadd.f32 %v512_v31, %v114_v36 }
 0xbce   :  { %v1076_v38 = vmul.f32 -1.442695, %v514_v37 }
 0xbd0   :  { %1133 = vpow2.f32 %v1076_v38 }
 0xbd6   :  { %v1134_v39 = vpop.eup %1133 }
 0xbd7   :  { %v518_v40 = vadd.f32 1.0, %v1134_v39 }
 0xbd9   :  { %1135 = vrcp.f32 %v518_v40  ;;  %v530_v10 = vand.u32 2147483648, %v518_v40  ;;  %vm524_vm5 = vweird.f32 %v518_v40  ;;  %v528_v43 = vand.u32 2147483647, %v518_v40 }
 0xbdb   :  { %v531_v45 = vor.u32 1.1754944e-38, %v530_v10  ;;  %vm529_vm7 = vcmp.eq.f32.partialorder %v528_v43, 8.507059e+37 }
 0xbdf   :  { %v1136_v3 = vpop.eup %1135 }
 0xbe0   :  { %v520_v7 = vmul.f32 %v1136_v3, %v518_v40  ;;  %vm525_vm4 = vweird.f32 %v1136_v3 }
 0xbe1   :  { %vm526_vm6 = vmor %vm524_vm5, %vm525_vm4 }
 0xbe2   :  { %v521_v41 = vsub.f32 1.0, %v520_v7 }
 0xbe4   :  { %v522_v9 = vmul.f32 %v1136_v3, %v521_v41 }
 0xbe6   :  { %v523_v42 = vadd.f32 %v1136_v3, %v522_v9 }
 0xbe8   :  { %v527_v44 = vsel %vm526_vm6, %v1136_v3, %v523_v42  ;;  %v688_v3 = vsel %vm687_vm15, 1, %v1203_v5  ;;  %v120_v42 = vadd.f32 %v1300_v13, %v1311_v20  ;;  %vm758_vm6 = vcmp.gt.s32.totalorder %v1250_v6, 8 }
 0xbe9   :  { %v532_v47 = vsel %vm529_vm7, %v531_v45, %v527_v44 }
 0xbea   :  { %v551_v53 = vsel %vm550_vm9, %v532_v47, 1.0 }
 0xbeb   :  { %v552_v54 = vsub.f32 1.0, %v551_v53  ;;  %v558_v56 = vmul.f32 %v551_v53, %v488_v26 }
 0xc26   :  { %v536_v46 = vpop.permute.xlu2 %535 }
 0xc27   :  { %v538_v48 = vmul.f32 %v536_v46, %v532_v47 }
 0xc29   :  { %540 = vrot.lane.b32.xlu0 %v538_v48, %s1205_s7 }
 0xc9b   :  { %v541_v49 = vpop.permute.xlu0 %540 }
 0xc9c   :  { %v543_v50 = vadd.f32 %v541_v49, %v114_v36 }
 0xc9e   :  { %1137 = vtanh.f32 %v543_v50 }
 0xca4   :  { %v1138_v51 = vpop.eup %1137 }
 0xca5   :  { %554 = vrot.lane.b32.xlu2 %v1138_v51, %s1206_s8 }
 0xcff   :  { %v555_v55 = vpop.permute.xlu2 %554 }
 0xd00   :  { %v557_v57 = vmul.f32 %v555_v55, %v552_v54 }
 0xd02   :  { %v559_v58 = vadd.f32 %v558_v56, %v557_v57 }
 0xd04   :  { %561 = vrot.lane.b32.xlu0 %v559_v58, %s1206_s8 }
 0xd0c   :  { %619 = vperm.xlu0 %1101, %v617_v59  }
 0xd76   :  { %v562_v61 = vpop.permute.xlu0 %561 }
 0xd77   :  { %1077 = vmatmul.msk.f32.vlgmr.msrb.gmra.mxu1 %vm135_vm8, %v562_v61 }
 0xd7e   :  { %v620_v31 = vpop.permute.xlu0 %619 }
 0xd7f   :  { %vm621_vm14 = vcmp.eq.s32.totalorder %v620_v31, 1 }
 0xdf4   :  { %v582_v62 = vpop.f32.mrf.mxu1 }
 0xdf5   :  { %v583_v63 = vadd.f32 %v582_v62, %v1307_v16 }
 0xdf7   :  { %606 = vrot.lane.b32.xlu1 %v583_v63, %s1205_s7  ;;  %v585_v2 = vadd.f32 %v583_v63, %v117_v1 }
 0xdf9   :  { %v1078_v4 = vmul.f32 -1.442695, %v585_v2 }
 0xdfb   :  { %1139 = vpow2.f32 %v1078_v4  ;;  %v759_v4 = vsel %vm758_vm6, 1, %v1203_v5 }
 0xe01   :  { %v1140_v8 = vpop.eup %1139 }
 0xe02   :  { %v589_v11 = vadd.f32 1.0, %v1140_v8 }
 0xe04   :  { %1141 = vrcp.f32 %v589_v11  ;;  %v601_v21 = vand.u32 2147483648, %v589_v11  ;;  %vm595_vm11 = vweird.f32 %v589_v11  ;;  %v599_v22 = vand.u32 2147483647, %v589_v11 }
 0xe06   :  { %v602_v24 = vor.u32 1.1754944e-38, %v601_v21  ;;  %vm600_vm13 = vcmp.eq.f32.partialorder %v599_v22, 8.507059e+37 }
 0xe0a   :  { %v1142_v12 = vpop.eup %1141 }
 0xe0b   :  { %v591_v15 = vmul.f32 %v1142_v12, %v589_v11  ;;  %vm596_vm0 = vweird.f32 %v1142_v12 }
 0xe0c   :  { %vm597_vm12 = vmor %vm595_vm11, %vm596_vm0 }
 0xe0d   :  { %v592_v17 = vsub.f32 1.0, %v591_v15  ;;  %v123_v15 = vadd.f32 %v1302_v14, %v1311_v20 }
 0xe0f   :  { %v593_v18 = vmul.f32 %v1142_v12, %v592_v17 }
 0xe11   :  { %v594_v19 = vadd.f32 %v1142_v12, %v593_v18 }
 0xe13   :  { %v598_v23 = vsel %vm597_vm12, %v1142_v12, %v594_v19  ;;  %vm829_vm12 = vcmp.gt.s32.totalorder %v1250_v6, 9 }
 0xe14   :  { %v603_v26 = vsel %vm600_vm13, %v602_v24, %v598_v23 }
 0xe15   :  { %v622_v32 = vsel %vm621_vm14, %v603_v26, 1.0 }
 0xe16   :  { %v623_v36 = vsub.f32 1.0, %v622_v32  ;;  %v629_v38 = vmul.f32 %v622_v32, %v559_v58 }
 0xe69   :  { %v607_v25 = vpop.permute.xlu1 %606 }
 0xe6a   :  { %v609_v27 = vmul.f32 %v607_v25, %v603_v26 }
 0xe6c   :  { %611 = vrot.lane.b32.xlu2 %v609_v27, %s1205_s7 }
 0xec6   :  { %v612_v28 = vpop.permute.xlu2 %611 }
 0xec7   :  { %v614_v29 = vadd.f32 %v612_v28, %v117_v1 }
 0xec9   :  { %1143 = vtanh.f32 %v614_v29 }
 0xecf   :  { %v1144_v30 = vpop.eup %1143 }
 0xed0   :  { %625 = vrot.lane.b32.xlu1 %v1144_v30, %s1206_s8 }
 0xf42   :  { %v626_v37 = vpop.permute.xlu1 %625 }
 0xf43   :  { %v628_v39 = vmul.f32 %v626_v37, %v623_v36 }
 0xf45   :  { %v630_v40 = vadd.f32 %v629_v38, %v628_v39 }
 0xf47   :  { %632 = vrot.lane.b32.xlu2 %v630_v40, %s1206_s8 }
 0xf4f   :  { %690 = vperm.xlu2 %1102, %v688_v3  }
 0xfa1   :  { %v633_v7 = vpop.permute.xlu2 %632 }
 0xfa2   :  { %1079 = vmatmul.msk.f32.vlgmr.msra.gmra.mxu2 %vm135_vm8, %v633_v7 }
 0xfa9   :  { %v691_v60 = vpop.permute.xlu2 %690 }
 0xfaa   :  { %vm692_vm5 = vcmp.eq.s32.totalorder %v691_v60, 1 }
0x1025   :  { %v653_v41 = vpop.f32.mrf.mxu2 }
0x1026   :  { %v654_v9 = vadd.f32 %v653_v41, %v1307_v16 }
0x1028   :  { %677 = vrot.lane.b32.xlu0 %v654_v9, %s1205_s7  ;;  %v656_v10 = vadd.f32 %v654_v9, %v120_v42 }
0x102a   :  { %v1080_v43 = vmul.f32 -1.442695, %v656_v10  ;;  %v830_v10 = vsel %vm829_vm12, 1, %v1203_v5 }
0x102c   :  { %1145 = vpow2.f32 %v1080_v43 }
0x1032   :  { %v1146_v44 = vpop.eup %1145 }
0x1033   :  { %v660_v45 = vadd.f32 1.0, %v1146_v44 }
0x1035   :  { %1147 = vrcp.f32 %v660_v45  ;;  %v672_v51 = vand.u32 2147483648, %v660_v45  ;;  %vm666_vm2 = vweird.f32 %v660_v45  ;;  %v670_v52 = vand.u32 2147483647, %v660_v45 }
0x1037   :  { %v673_v54 = vor.u32 1.1754944e-38, %v672_v51  ;;  %vm671_vm4 = vcmp.eq.f32.partialorder %v670_v52, 8.507059e+37 }
0x103b   :  { %v1148_v46 = vpop.eup %1147 }
0x103c   :  { %v662_v47 = vmul.f32 %v1148_v46, %v660_v45  ;;  %vm667_vm1 = vweird.f32 %v1148_v46 }
0x103d   :  { %vm668_vm3 = vmor %vm666_vm2, %vm667_vm1 }
0x103e   :  { %v663_v48 = vsub.f32 1.0, %v662_v47 }
0x1040   :  { %v664_v49 = vmul.f32 %v1148_v46, %v663_v48 }
0x1042   :  { %v665_v50 = vadd.f32 %v1148_v46, %v664_v49 }
0x1044   :  { %v669_v53 = vsel %vm668_vm3, %v1148_v46, %v665_v50  ;;  %v126_v46 = vadd.f32 %v1361_v33, %v1311_v20 }
0x1045   :  { %v674_v55 = vsel %vm671_vm4, %v673_v54, %v669_v53 }
0x1046   :  { %v693_v61 = vsel %vm692_vm5, %v674_v55, 1.0 }
0x1047   :  { %v694_v62 = vsub.f32 1.0, %v693_v61  ;;  %v700_v0 = vmul.f32 %v693_v61, %v630_v40 }
0x109a   :  { %v678_v13 = vpop.permute.xlu0 %677 }
0x109b   :  { %v680_v56 = vmul.f32 %v678_v13, %v674_v55 }
0x109d   :  { %682 = vrot.lane.b32.xlu1 %v680_v56, %s1205_s7 }
0x110f   :  { %v683_v57 = vpop.permute.xlu1 %682 }
0x1110   :  { %v685_v58 = vadd.f32 %v683_v57, %v120_v42 }
0x1112   :  { %1149 = vtanh.f32 %v685_v58 }
0x1118   :  { %v1150_v59 = vpop.eup %1149 }
0x1119   :  { %696 = vrot.lane.b32.xlu0 %v1150_v59, %s1206_s8 }
0x118b   :  { %v697_v63 = vpop.permute.xlu0 %696 }
0x118c   :  { %v699_v1 = vmul.f32 %v697_v63, %v694_v62 }
0x118e   :  { %v701_v2 = vadd.f32 %v700_v0, %v699_v1 }
0x1190   :  { %703 = vrot.lane.b32.xlu1 %v701_v2, %s1206_s8 }
0x1198   :  { %761 = vperm.xlu1 %1100, %v759_v4  }
0x1202   :  { %v704_v8 = vpop.permute.xlu1 %703 }
0x1203   :  { %1081 = vmatmul.msk.f32.vlgmr.msrb.gmra.mxu3 %vm135_vm8, %v704_v8 }
0x120a   :  { %v762_v39 = vpop.permute.xlu1 %761 }
0x120b   :  { %vm763_vm11 = vcmp.eq.s32.totalorder %v762_v39, 1 }
0x1286   :  { %v724_v11 = vpop.f32.mrf.mxu3 }
0x1287   :  { %v725_v12 = vadd.f32 %v724_v11, %v1307_v16 }
0x1289   :  { %748 = vrot.lane.b32.xlu2 %v725_v12, %s1205_s7  ;;  %v727_v17 = vadd.f32 %v725_v12, %v123_v15  ;;  %v1175_v12 = vld [vmem:[%s1520_s0] sm:$0xff] }
0x128a   :  { %vm900_vm3 = vcmp.gt.s32.totalorder %v1175_v12, 10 }
0x128b   :  { %v1082_v18 = vmul.f32 -1.442695, %v727_v17 }
0x128d   :  { %1151 = vpow2.f32 %v1082_v18 }
0x1293   :  { %v1152_v19 = vpop.eup %1151 }
0x1294   :  { %v731_v21 = vadd.f32 1.0, %v1152_v19 }
0x1296   :  { %1153 = vrcp.f32 %v731_v21  ;;  %v743_v27 = vand.u32 2147483648, %v731_v21  ;;  %vm737_vm9 = vweird.f32 %v731_v21  ;;  %v741_v28 = vand.u32 2147483647, %v731_v21 }
0x1298   :  { %v744_v30 = vor.u32 1.1754944e-38, %v743_v27  ;;  %vm742_vm0 = vcmp.eq.f32.partialorder %v741_v28, 8.507059e+37 }
0x129c   :  { %v1154_v22 = vpop.eup %1153 }
0x129d   :  { %v733_v23 = vmul.f32 %v1154_v22, %v731_v21  ;;  %vm738_vm7 = vweird.f32 %v1154_v22  ;;  %v129_v21 = vadd.f32 %v1363_v34, %v1311_v20 }
0x129e   :  { %vm739_vm10 = vmor %vm737_vm9, %vm738_vm7 }
0x129f   :  { %v734_v24 = vsub.f32 1.0, %v733_v23 }
0x12a1   :  { %v735_v25 = vmul.f32 %v1154_v22, %v734_v24 }
0x12a3   :  { %v736_v26 = vadd.f32 %v1154_v22, %v735_v25 }
0x12a5   :  { %v740_v29 = vsel %vm739_vm10, %v1154_v22, %v736_v26  ;;  %vm971_vm10 = vcmp.gt.s32.totalorder %v1175_v12, 11 }
0x12a6   :  { %v745_v31 = vsel %vm742_vm0, %v744_v30, %v740_v29 }
0x12a7   :  { %v764_v40 = vsel %vm763_vm11, %v745_v31, 1.0 }
0x12a8   :  { %v765_v3 = vsub.f32 1.0, %v764_v40  ;;  %v771_v41 = vmul.f32 %v764_v40, %v701_v2 }
0x12e3   :  { %v749_v14 = vpop.permute.xlu2 %748 }
0x12e4   :  { %v751_v32 = vmul.f32 %v749_v14, %v745_v31 }
0x12e6   :  { %753 = vrot.lane.b32.xlu0 %v751_v32, %s1205_s7 }
0x1358   :  { %v754_v36 = vpop.permute.xlu0 %753 }
0x1359   :  { %v756_v37 = vadd.f32 %v754_v36, %v123_v15  ;;  %v901_v15 = vsel %vm900_vm3, 1, %v1203_v5 }
0x135b   :  { %1155 = vtanh.f32 %v756_v37 }
0x1361   :  { %v1156_v38 = vpop.eup %1155 }
0x1362   :  { %767 = vrot.lane.b32.xlu2 %v1156_v38, %s1206_s8 }
0x13bc   :  { %v768_v7 = vpop.permute.xlu2 %767 }
0x13bd   :  { %v770_v9 = vmul.f32 %v768_v7, %v765_v3 }
0x13bf   :  { %v772_v42 = vadd.f32 %v771_v41, %v770_v9 }
0x13c1   :  { %774 = vrot.lane.b32.xlu0 %v772_v42, %s1206_s8 }
0x13c9   :  { %832 = vperm.xlu0 %1101, %v830_v10  }
0x1433   :  { %v775_v43 = vpop.permute.xlu0 %774 }
0x1434   :  { %1083 = vmatmul.msk.f32.vlgmr.msra.gmra.mxu1 %vm135_vm8, %v775_v43 }
0x143b   :  { %v833_v63 = vpop.permute.xlu0 %832 }
0x143c   :  { %vm834_vm2 = vcmp.eq.s32.totalorder %v833_v63, 1  ;;  %v24_v63 = vld [vmem:[%s1522_s2 + $0x48] sm:$0xff] }
0x14b1   :  { %v795_v44 = vpop.f32.mrf.mxu1 }
0x14b2   :  { %v796_v45 = vadd.f32 %v795_v44, %v1307_v16 }
0x14b4   :  { %819 = vrot.lane.b32.xlu1 %v796_v45, %s1205_s7  ;;  %v798_v47 = vadd.f32 %v796_v45, %v126_v46  ;;  %v972_v45 = vsel %vm971_vm10, 1, %v1203_v5 }
0x14b6   :  { %v1084_v48 = vmul.f32 -1.442695, %v798_v47 }
0x14b8   :  { %1157 = vpow2.f32 %v1084_v48 }
0x14be   :  { %v1158_v49 = vpop.eup %1157 }
0x14bf   :  { %v802_v50 = vadd.f32 1.0, %v1158_v49  ;;  %v132_v49 = vadd.f32 %v1365_v35, %v1311_v20 }
0x14c1   :  { %1159 = vrcp.f32 %v802_v50  ;;  %v814_v13 = vand.u32 2147483648, %v802_v50  ;;  %vm808_vm14 = vweird.f32 %v802_v50  ;;  %v812_v55 = vand.u32 2147483647, %v802_v50 }
0x14c3   :  { %v815_v57 = vor.u32 1.1754944e-38, %v814_v13  ;;  %vm813_vm1 = vcmp.eq.f32.partialorder %v812_v55, 8.507059e+37 }
0x14c7   :  { %v1160_v6 = vpop.eup %1159 }
0x14c8   :  { %v804_v51 = vmul.f32 %v1160_v6, %v802_v50  ;;  %vm809_vm13 = vweird.f32 %v1160_v6 }
0x14c9   :  { %vm810_vm15 = vmor %vm808_vm14, %vm809_vm13 }
0x14ca   :  { %v805_v52 = vsub.f32 1.0, %v804_v51 }
0x14cc   :  { %v806_v53 = vmul.f32 %v1160_v6, %v805_v52 }
0x14ce   :  { %v807_v54 = vadd.f32 %v1160_v6, %v806_v53 }
0x14d0   :  { %v811_v56 = vsel %vm810_vm15, %v1160_v6, %v807_v54 }
0x14d1   :  { %v816_v58 = vsel %vm813_vm1, %v815_v57, %v811_v56 }
0x14d2   :  { %v835_v0 = vsel %vm834_vm2, %v816_v58, 1.0 }
0x14d3   :  { %v836_v1 = vsub.f32 1.0, %v835_v0  ;;  %v842_v4 = vmul.f32 %v835_v0, %v772_v42  ;;  %v23_v0 = vld [vmem:[%s1522_s2 + $0x40] sm:$0xff] }
0x1526   :  { %v820_v33 = vpop.permute.xlu1 %819 }
0x1527   :  { %v822_v59 = vmul.f32 %v820_v33, %v816_v58 }
0x1529   :  { %824 = vrot.lane.b32.xlu2 %v822_v59, %s1205_s7 }
0x1583   :  { %v825_v60 = vpop.permute.xlu2 %824 }
0x1584   :  { %v827_v61 = vadd.f32 %v825_v60, %v126_v46 }
0x1586   :  { %1161 = vtanh.f32 %v827_v61 }
0x158c   :  { %v1162_v62 = vpop.eup %1161 }
0x158d   :  { %838 = vrot.lane.b32.xlu1 %v1162_v62, %s1206_s8  ;;  %v25_v62 = vld [vmem:[%s1522_s2 + $0x50] sm:$0xff] }
0x158e   :  { %1004 = vmatpush.msrb.mxu1 %v25_v62 }
0x1590   :  { %1005 = vmatpush.msrb.mxu1 %v24_v63 }
0x1592   :  { %1006 = vmatpush.msrb.mxu1 %v23_v0 }
0x15ff   :  { %v839_v2 = vpop.permute.xlu1 %838 }
0x1600   :  { %v841_v8 = vmul.f32 %v839_v2, %v836_v1  ;;  %v22_v1 = vld [vmem:[%s1522_s2 + $0x38] sm:$0xff] }
0x1601   :  { %1007 = vmatpush.msrb.mxu1 %v22_v1 }
0x1602   :  { %v843_v11 = vadd.f32 %v842_v4, %v841_v8 }
0x1604   :  { %845 = vrot.lane.b32.xlu2 %v843_v11, %s1206_s8 }
0x160c   :  { %903 = vperm.xlu2 %1102, %v901_v15  }
0x165e   :  { %v846_v17 = vpop.permute.xlu2 %845 }
0x165f   :  { %1085 = vmatmul.msk.f32.vlgmr.msrb.gmra.mxu2 %vm135_vm8, %v846_v17 }
0x1666   :  { %v904_v7 = vpop.permute.xlu2 %903 }
0x1667   :  { %vm905_vm9 = vcmp.eq.s32.totalorder %v904_v7, 1 }
0x16e2   :  { %v866_v18 = vpop.f32.mrf.mxu2 }
0x16e3   :  { %v867_v19 = vadd.f32 %v866_v18, %v1307_v16  ;;  %v29_v18 = vld [vmem:[%s1522_s2 + $0x70] sm:$0xff] }
0x16e4   :  { %1029 = vmatpush.msra.mxu2 %v29_v18 }
0x16e5   :  { %890 = vrot.lane.b32.xlu0 %v867_v19, %s1205_s7  ;;  %v869_v22 = vadd.f32 %v867_v19, %v129_v21  ;;  %v28_v19 = vld [vmem:[%s1522_s2 + $0x68] sm:$0xff] }
0x16e6   :  { %1030 = vmatpush.msra.mxu2 %v28_v19 }
0x16e7   :  { %v1086_v23 = vmul.f32 -1.442695, %v869_v22  ;;  %v27_v22 = vld [vmem:[%s1522_s2 + $0x60] sm:$0xff] }
0x16e8   :  { %1031 = vmatpush.msra.mxu2 %v27_v22 }
0x16e9   :  { %1163 = vpow2.f32 %v1086_v23  ;;  %v26_v23 = vld [vmem:[%s1522_s2 + $0x58] sm:$0xff] }
0x16ea   :  { %1032 = vmatpush.msra.mxu2 %v26_v23 }
0x16ef   :  { %v1164_v24 = vpop.eup %1163 }
0x16f0   :  { %v873_v25 = vadd.f32 1.0, %v1164_v24  ;;  %v1176_v24 = vld [vmem:[%s1522_s2 + $0x30] sm:$0xff] }
0x16f2   :  { %1165 = vrcp.f32 %v873_v25  ;;  %v885_v14 = vand.u32 2147483648, %v873_v25  ;;  %vm879_vm5 = vweird.f32 %v873_v25  ;;  %v883_v31 = vand.u32 2147483647, %v873_v25 }
0x16f4   :  { %v886_v36 = vor.u32 1.1754944e-38, %v885_v14  ;;  %vm884_vm7 = vcmp.eq.f32.partialorder %v883_v31, 8.507059e+37 }
0x16f8   :  { %v1166_v26 = vpop.eup %1165 }
0x16f9   :  { %v875_v27 = vmul.f32 %v1166_v26, %v873_v25  ;;  %vm880_vm4 = vweird.f32 %v1166_v26  ;;  %v986_v25 = vperm.slane %v1176_v24, 2 }
0x16fa   :  { %vm881_vm6 = vmor %vm879_vm5, %vm880_vm4 }
0x16fb   :  { %v876_v28 = vsub.f32 1.0, %v875_v27 }
0x16fd   :  { %v877_v29 = vmul.f32 %v1166_v26, %v876_v28 }
0x16ff   :  { %v878_v30 = vadd.f32 %v1166_v26, %v877_v29  ;;  %v1013_v29 = vperm.slane %v1176_v24, 3 }
0x1701   :  { %v882_v32 = vsel %vm881_vm6, %v1166_v26, %v878_v30 }
0x1702   :  { %v887_v37 = vsel %vm884_vm7, %v886_v36, %v882_v32 }
0x1703   :  { %v906_v41 = vsel %vm905_vm9, %v887_v37, 1.0 }
0x1704   :  { %v907_v9 = vsub.f32 1.0, %v906_v41  ;;  %v913_v10 = vmul.f32 %v906_v41, %v843_v11 }
0x1757   :  { %v891_v34 = vpop.permute.xlu0 %890 }
0x1758   :  { %v893_v38 = vmul.f32 %v891_v34, %v887_v37 }
0x175a   :  { %895 = vrot.lane.b32.xlu1 %v893_v38, %s1205_s7 }
0x17cc   :  { %v896_v39 = vpop.permute.xlu1 %895 }
0x17cd   :  { %v898_v40 = vadd.f32 %v896_v39, %v129_v21 }
0x17cf   :  { %1167 = vtanh.f32 %v898_v40 }
0x17d5   :  { %v1168_v3 = vpop.eup %1167 }
0x17d6   :  { %909 = vrot.lane.b32.xlu0 %v1168_v3, %s1206_s8 }
0x1848   :  { %v910_v42 = vpop.permute.xlu0 %909 }
0x1849   :  { %v912_v43 = vmul.f32 %v910_v42, %v907_v9 }
0x184b   :  { %v914_v44 = vadd.f32 %v913_v10, %v912_v43 }
0x184d   :  { %916 = vrot.lane.b32.xlu1 %v914_v44, %s1206_s8 }
0x1855   :  { %974 = vperm.xlu1 %1100, %v972_v45  }
0x18bf   :  { %v917_v46 = vpop.permute.xlu1 %916 }
0x18c0   :  { %1087 = vmatmul.msk.f32.vlgmr.msra.gmra.mxu3 %vm135_vm8, %v917_v46 }
0x18c7   :  { %v975_v2 = vpop.permute.xlu1 %974 }
0x18c8   :  { %vm976_vm14 = vcmp.eq.s32.totalorder %v975_v2, 1 }
0x1943   :  { %v937_v47 = vpop.f32.mrf.mxu3 }
0x1944   :  { %v938_v48 = vadd.f32 %v937_v47, %v1307_v16 }
0x1946   :  { %961 = vrot.lane.b32.xlu2 %v938_v48, %s1205_s7  ;;  %v940_v50 = vadd.f32 %v938_v48, %v132_v49 }
0x1948   :  { %v1088_v6 = vmul.f32 -1.442695, %v940_v50 }
0x194a   :  { %1169 = vpow2.f32 %v1088_v6 }
0x1950   :  { %v1170_v51 = vpop.eup %1169 }
0x1951   :  { %v944_v52 = vadd.f32 1.0, %v1170_v51 }
0x1953   :  { %1171 = vrcp.f32 %v944_v52  ;;  %v956_v56 = vand.u32 2147483648, %v944_v52  ;;  %vm950_vm11 = vweird.f32 %v944_v52  ;;  %v954_v16 = vand.u32 2147483647, %v944_v52 }
0x1955   :  { %v957_v33 = vor.u32 1.1754944e-38, %v956_v56  ;;  %vm955_vm13 = vcmp.eq.f32.partialorder %v954_v16, 8.507059e+37 }
0x1959   :  { %v1172_v53 = vpop.eup %1171 }
0x195a   :  { %v946_v5 = vmul.f32 %v1172_v53, %v944_v52  ;;  %vm951_vm0 = vweird.f32 %v1172_v53 }
0x195b   :  { %vm952_vm12 = vmor %vm950_vm11, %vm951_vm0 }
0x195c   :  { %v947_v54 = vsub.f32 1.0, %v946_v5 }
0x195e   :  { %v948_v13 = vmul.f32 %v1172_v53, %v947_v54 }
0x1960   :  { %v949_v55 = vadd.f32 %v1172_v53, %v948_v13 }
0x1962   :  { %v953_v57 = vsel %vm952_vm12, %v1172_v53, %v949_v55 }
0x1963   :  { %v958_v35 = vsel %vm955_vm13, %v957_v33, %v953_v57 }
0x1964   :  { %v977_v4 = vsel %vm976_vm14, %v958_v35, 1.0 }
0x1965   :  { %v978_v8 = vsub.f32 1.0, %v977_v4  ;;  %v984_v12 = vmul.f32 %v977_v4, %v914_v44 }
0x19a0   :  { %v962_v20 = vpop.permute.xlu2 %961 }
0x19a1   :  { %v964_v58 = vmul.f32 %v962_v20, %v958_v35 }
0x19a3   :  { %966 = vrot.lane.b32.xlu0 %v964_v58, %s1205_s7 }
0x1a15   :  { %v967_v59 = vpop.permute.xlu0 %966 }
0x1a16   :  { %v969_v60 = vadd.f32 %v967_v59, %v132_v49 }
0x1a18   :  { %1173 = vtanh.f32 %v969_v60 }
0x1a1e   :  { %v1174_v61 = vpop.eup %1173 }
0x1a1f   :  { %980 = vrot.lane.b32.xlu2 %v1174_v61, %s1206_s8 }
0x1a79   :  { %v981_v11 = vpop.permute.xlu2 %980 }
0x1a7a   :  { %v983_v15 = vmul.f32 %v981_v11, %v978_v8 }
0x1a7c   :  { %v985_v17 = vadd.f32 %v984_v12, %v983_v15 }
0x1a7e   :  { %988 = vrot.lane.b32.xlu0 %v985_v17, %s1206_s8 }
0x1af0   :  { %v989_v21 = vpop.permute.xlu0 %988 }
0x1af1   :  { %1089 = vmatmul.msk.f32.vlgmr.msrb.gmra.mxu1 %vm135_vm8, %v989_v21 }
0x1b6e   :  { %v1009_v26 = vpop.f32.mrf.mxu1 }
0x1b6f   :  { %v1010_v27 = vadd.f32 %v1009_v26, %v986_v25 }
0x1b71   :  { %v1012_v28 = vmax.f32 %v1010_v27, 0.0 }
0x1b73   :  { %1090 = vmatmul.msk.f32.vlgmr.msra.gmra.mxu2 %vm135_vm8, %v1012_v28 }
0x1bf6   :  { %v1034_v30 = vpop.f32.mrf.mxu2 }
0x1bf7   :  { %v1035_v14 = vadd.f32 %v1034_v30, %v1013_v29 }
0x1bf9   :  { %1037 = vst [vmem:[#allocation2] sm:$0xff] %v1035_v14 }
0x1bfa   :  { %1048 = dma.vmem_to_hbm [thread:$0]  %s1044_s19, 128, %s1046_s22, [#allocation3]  }
0x1bfb   :  { %1201 = dma.done.wait [#allocation3], 128  }
0x1bfc   :  { %1202 = vsyncadd [#allocation3], 4294967168 }
0x1bfd   :  { %1053 = vsyncpa [#allocation3], 1 }

</bundles_post_ra>
